<compile_context>
chip_gen: v6e
topology: v6e:2x2x1
jax: 0.10.0
libtpu: 0.0.40
codegen_flags: <defaults>
</compile_context>

<pallas_src>
import math
import functools

import jax
import jax.numpy as jnp
import numpy as np
from jax.experimental import pallas as pl
from jax.experimental.pallas import tpu as pltpu


def _mha_kernel(xq_ref, xk_ref, xv_ref, mask_ref,
                wq_ref, bq_ref, wk_ref, bk_ref, wv_ref, bv_ref,
                wo_ref, bo_ref, out_ref,
                *, num_heads, head_dim, block_batch, seq_len, inv_scale):
    M, E = xq_ref.shape                      # M = Bt * S, lane-dense E
    Bt, S = block_batch, seq_len
    H, D = num_heads, head_dim
    cd = wq_ref.dtype                        # MXU input dtype (bf16); accumulation f32
    f32 = jnp.float32

    # Q/K/V projections: tall-M, lane-dense 2D matmuls (MXU, f32 accumulation).
    # 1/sqrt(D) folded into Q once.
    qp = (jnp.dot(xq_ref[...], wq_ref[...], preferred_element_type=f32)
          + bq_ref[...]) * inv_scale
    kp = jnp.dot(xk_ref[...], wk_ref[...], preferred_element_type=f32) + bk_ref[...]
    vp = jnp.dot(xv_ref[...], wv_ref[...], preferred_element_type=f32) + bv_ref[...]
    qp = qp.astype(cd)
    kp = kp.astype(cd)
    vp = vp.astype(cd)

    # Additive mask bias: computed once per block, reused by every head.  Large finite
    # negative (not -inf) so fully-masked rows stay NaN-free through the softmax.
    mvals = mask_ref[...].astype(jnp.int32)                 # int8 on HBM, unpack here
    bias = jnp.where(mvals == 0, f32(-1e30), f32(0.0))      # (Bt, S, S)

    wo = wo_ref[...]                                        # load once, slice per head

    # Per-head attention (tiny static head count); attention matmuls are batched over
    # the Bt batch dim.  Each head's context goes straight into the output-projection
    # accumulator (lane-dense (M, E)), so there are no D-wide masked partial stores and
    # no ctx scratch buffer.
    out_acc = jnp.zeros((M, E), dtype=f32)
    for h in range(H):
        lo = h * D
        qh = qp[:, lo:lo + D].reshape(Bt, S, D)
        kh = kp[:, lo:lo + D].reshape(Bt, S, D)
        vh = vp[:, lo:lo + D].reshape(Bt, S, D)

        # Contract on the last axis of both operands (no explicit transpose).
        s = jnp.einsum('bqd,bkd->bqk', qh, kh,
                       preferred_element_type=f32) + bias   # (Bt, S, S)

        # Numerically stable softmax in f32 (v5e-safe); EUP reciprocal, not VALU divide.
        m = jnp.max(s, axis=-1, keepdims=True)
        p = jnp.exp(s - m)
        denom = jnp.sum(p, axis=-1, keepdims=True)
        p = p * pl.reciprocal(denom, approx=True)

        ctx_h = jnp.einsum('bqk,bkd->bqd', p.astype(cd), vh,
                           preferred_element_type=f32)      # (Bt, S, D)
        ctx2 = ctx_h.reshape(M, D).astype(cd)
        out_acc = out_acc + jnp.dot(ctx2, wo[lo:lo + D, :],
                                    preferred_element_type=f32)

    out_ref[...] = (out_acc + bo_ref[...]).astype(out_ref.dtype)


def masked_mha_pallas(query, key, value, mask, params, *, num_heads,
                      compute_dtype=jnp.bfloat16, block_batch=None):
    """query/key/value: (B, S, E) f32; mask: (B, S, S), 0 = masked out."""
    B, S, E = query.shape
    assert E % num_heads == 0
    head_dim = E // num_heads
    inv_scale = 1.0 / math.sqrt(head_dim)

    wq, bq, wk, bk, wv, bv, wo, bo = params   # weights (E,E) in->out; biases (1,E)
    # Cast weights AND activations to the MXU compute dtype in the wrapper (halves the
    # DMA + resident VMEM; numerics unchanged since the kernel already computed in bf16
    # with f32 accumulation).  Biases stay f32 and are added to f32-accumulated results.
    wq, wk, wv, wo = (w.astype(compute_dtype) for w in (wq, wk, wv, wo))
    bq, bk, bv, bo = (b.astype(jnp.float32) for b in (bq, bk, bv, bo))

    # Flatten to (B*S, E) here so the kernel sees clean 2D tiles (no in-kernel reshape).
    q2 = query.reshape(B * S, E).astype(compute_dtype)
    k2 = key.reshape(B * S, E).astype(compute_dtype)
    v2 = value.reshape(B * S, E).astype(compute_dtype)
    mask_i8 = (mask != 0).astype(jnp.int8)    # 4x less mask traffic than int32

    # Physical VMEM (64 MiB/TC on v7x, 128 MiB on v5e/v6e) drives tiling + limits.
    try:
        phys_vmem = int(pltpu.get_tpu_info().vmem_capacity_bytes)
    except Exception:
        phys_vmem = 64 * 2**20

    if block_batch is None:
        # Enough rows per grid step to fill the MXU / amortize ~0.35us per-step cost;
        # larger blocks on 128-MiB-VMEM parts (v5e/v6e).
        target_rows = 512 if phys_vmem >= 96 * 2**20 else 256
        bt = max(1, min(B, target_rows // max(S, 1)))
        if B >= 2:
            bt = min(bt, B // 2)   # keep grid >= 2 so both v7x TensorCores get work
        while B % bt:
            bt -= 1
        block_batch = bt
    Bt = block_batch
    assert B % Bt == 0
    grid = (B // Bt,)

    # Scoped-VMEM limit from the real (bf16 / int8 / f32) resident footprint with
    # headroom, clamped below physical capacity (never the full 64 MiB on v7x).
    itemsize = jnp.dtype(compute_dtype).itemsize
    rows = Bt * S
    est = (2 * 4 * E * E * itemsize            # proj weights (worst case double-buffered)
           + 2 * 4 * E * 4                     # biases
           + 2 * 3 * rows * E * itemsize       # q/k/v tiles, double-buffered
           + 2 * Bt * S * S                    # int8 mask tiles, double-buffered
           + 2 * rows * E * 4                  # f32 output tiles, double-buffered
           + 2 * Bt * S * S * 4                # live scores / softmax temporaries
           + 4 * rows * E * 4)                 # projections + output accumulator
    vmem_limit = int(min(max(int(est * 1.5), 32 * 2**20), int(phys_vmem * 0.85)))

    kernel = functools.partial(
        _mha_kernel, num_heads=num_heads, head_dim=head_dim,
        block_batch=Bt, seq_len=S, inv_scale=inv_scale)

    act_spec = pl.BlockSpec((Bt * S, E), lambda b: (b, 0))
    mask_spec = pl.BlockSpec((Bt, S, S), lambda b: (b, 0, 0))
    out_spec = pl.BlockSpec((Bt * S, E), lambda b: (b, 0))

    def build(single_buffer_weights):
        # Grid-invariant weights/biases: single-buffer them (the default pipeline would
        # otherwise hold 2 copies resident -- critical headroom at large E on v7x).
        wkw = dict(pipeline_mode=pl.Buffered(1)) if single_buffer_weights else {}
        w_spec = pl.BlockSpec((E, E), lambda b: (0, 0), **wkw)
        b_spec = pl.BlockSpec((1, E), lambda b: (0, 0), **wkw)
        return pl.pallas_call(
            kernel,
            out_shape=jax.ShapeDtypeStruct((B * S, E), jnp.float32),
            grid_spec=pltpu.PrefetchScalarGridSpec(
                num_scalar_prefetch=0,
                grid=grid,
                in_specs=[act_spec, act_spec, act_spec, mask_spec,
                          w_spec, b_spec, w_spec, b_spec, w_spec, b_spec,
                          w_spec, b_spec],
                out_specs=out_spec),
            compiler_params=pltpu.CompilerParams(
                dimension_semantics=("parallel",),
                vmem_limit_bytes=vmem_limit))

    args = (q2, k2, v2, mask_i8, wq, bq, wk, bk, wv, bv, wo, bo)
    try:
        out_flat = build(True)(*args)
    except Exception:
        # Fallback for environments without single-buffer pipeline_mode support
        # (correctness identical, just double-buffered weight blocks).
        out_flat = build(False)(*args)

    return out_flat.reshape(B, S, E)


def masked_mha_ref(query, key, value, mask, params, *, num_heads):
    """Pure-JAX f32 reference matching the PyTorch forward pass."""
    B, S, E = query.shape
    D = E // num_heads
    wq, bq, wk, bk, wv, bv, wo, bo = params
    scale = jnp.sqrt(jnp.float32(D))

    def proj(x, w, b):
        return x @ w + b  # (B,S,E)

    Q = proj(query, wq, bq).reshape(B, S, num_heads, D).transpose(0, 2, 1, 3)
    K = proj(key, wk, bk).reshape(B, S, num_heads, D).transpose(0, 2, 1, 3)
    V = proj(value, wv, bv).reshape(B, S, num_heads, D).transpose(0, 2, 1, 3)

    scores = jnp.einsum('bhqd,bhkd->bhqk', Q, K) / scale
    scores = jnp.where(mask[:, None, :, :] == 0, -jnp.inf, scores)
    attn = jax.nn.softmax(scores, axis=-1)
    context = jnp.einsum('bhqk,bhkd->bhqd', attn, V)
    context = context.transpose(0, 2, 1, 3).reshape(B, S, E)
    return context @ wo + bo


if __name__ == "__main__":
    B, S, E, H = 2, 8, 32, 4

    key0 = jax.random.PRNGKey(0)
    ks = jax.random.split(key0, 12)

    def w_init(k):
        return jax.random.normal(k, (E, E), dtype=jnp.float32) * 0.1

    def b_init(k):
        return jax.random.normal(k, (1, E), dtype=jnp.float32) * 0.1

    params = (w_init(ks[0]), b_init(ks[1]),    # q
              w_init(ks[2]), b_init(ks[3]),    # k
              w_init(ks[4]), b_init(ks[5]),    # v
              w_init(ks[6]), b_init(ks[7]))    # out

    query = jax.random.normal(ks[8], (B, S, E), dtype=jnp.float32)
    key_in = jax.random.normal(ks[9], (B, S, E), dtype=jnp.float32)
    value = jax.random.normal(ks[10], (B, S, E), dtype=jnp.float32)

    # Causal mask (0 = masked out), broadcast identically across heads.
    causal = jnp.tril(jnp.ones((S, S), dtype=jnp.int32))
    mask = jnp.broadcast_to(causal, (B, S, S))

    out = masked_mha_pallas(query, key_in, value, mask, params, num_heads=H)
    out = jax.block_until_ready(out)

    ref = masked_mha_ref(query, key_in, value, mask, params, num_heads=H)
    # bf16 matmul inputs (f32 accumulation) + approx reciprocal -> loosened tolerance
    # vs the pure-f32 reference (intentional).
    np.testing.assert_allclose(np.asarray(out), np.asarray(ref), atol=2e-2, rtol=2e-2)

    print("KERNEL_OK")
</pallas_src>

<mosaic_0001>
module attributes {stable_mosaic.version = 11 : i64} {
  func.func @_mha_kernel(%arg0: i32, %arg1: memref<8x32xbf16, #tpu.memory_space<vmem>>, %arg2: memref<8x32xbf16, #tpu.memory_space<vmem>>, %arg3: memref<8x32xbf16, #tpu.memory_space<vmem>>, %arg4: memref<1x8x8xi8, #tpu.memory_space<vmem>>, %arg5: memref<32x32xbf16, #tpu.memory_space<vmem>>, %arg6: memref<1x32xf32, #tpu.memory_space<vmem>>, %arg7: memref<32x32xbf16, #tpu.memory_space<vmem>>, %arg8: memref<1x32xf32, #tpu.memory_space<vmem>>, %arg9: memref<32x32xbf16, #tpu.memory_space<vmem>>, %arg10: memref<1x32xf32, #tpu.memory_space<vmem>>, %arg11: memref<32x32xbf16, #tpu.memory_space<vmem>>, %arg12: memref<1x32xf32, #tpu.memory_space<vmem>>, %arg13: memref<8x32xf32, #tpu.memory_space<vmem>>) attributes {dimension_semantics = [#tpu.dimension_semantics<parallel>], iteration_bounds = array<i64: 2>, scalar_prefetch = 0 : i64, scratch_operands = 0 : i64, tpu.core_type = #tpu.core_type<tc>, window_params = [{transform_indices = @transform_0, window_bounds = array<i64: 8, 32>}, {transform_indices = @transform_1, window_bounds = array<i64: 8, 32>}, {transform_indices = @transform_2, window_bounds = array<i64: 8, 32>}, {transform_indices = @transform_3, window_bounds = array<i64: 1, 8, 8>}, {pipeline_mode = #tpu.pipeline_mode<synchronous>, transform_indices = @transform_4, window_bounds = array<i64: 32, 32>}, {pipeline_mode = #tpu.pipeline_mode<synchronous>, transform_indices = @transform_5, window_bounds = array<i64: 1, 32>}, {pipeline_mode = #tpu.pipeline_mode<synchronous>, transform_indices = @transform_6, window_bounds = array<i64: 32, 32>}, {pipeline_mode = #tpu.pipeline_mode<synchronous>, transform_indices = @transform_7, window_bounds = array<i64: 1, 32>}, {pipeline_mode = #tpu.pipeline_mode<synchronous>, transform_indices = @transform_8, window_bounds = array<i64: 32, 32>}, {pipeline_mode = #tpu.pipeline_mode<synchronous>, transform_indices = @transform_9, window_bounds = array<i64: 1, 32>}, {pipeline_mode = #tpu.pipeline_mode<synchronous>, transform_indices = @transform_10, window_bounds = array<i64: 32, 32>}, {pipeline_mode = #tpu.pipeline_mode<synchronous>, transform_indices = @transform_11, window_bounds = array<i64: 1, 32>}, {transform_indices = @transform_12, window_bounds = array<i64: 8, 32>}]} {
    %c0 = arith.constant 0 : index
    %c0_0 = arith.constant 0 : index
    %0 = vector.load %arg1[%c0, %c0_0] : memref<8x32xbf16, #tpu.memory_space<vmem>>, vector<8x32xbf16>
    %c0_1 = arith.constant 0 : index
    %c0_2 = arith.constant 0 : index
    %1 = vector.load %arg5[%c0_1, %c0_2] : memref<32x32xbf16, #tpu.memory_space<vmem>>, vector<32x32xbf16>
    %cst = arith.constant dense<0.000000e+00> : vector<8x32xf32>
    %2 = tpu.matmul %0, %1, %cst {dimension_numbers = #tpu.dot_dimension_numbers<[1], [0], [0], [1], [0, 0, 1, 1], [], []>} : vector<8x32xbf16>, vector<32x32xbf16>, vector<8x32xf32> -> vector<8x32xf32>
    %c0_3 = arith.constant 0 : index
    %c0_4 = arith.constant 0 : index
    %3 = vector.load %arg6[%c0_3, %c0_4] : memref<1x32xf32, #tpu.memory_space<vmem>>, vector<1x32xf32>
    %4 = vector.broadcast %3 : vector<1x32xf32> to vector<8x32xf32>
    %5 = arith.addf %2, %4 : vector<8x32xf32>
    %cst_5 = arith.constant 0.353553385 : f32
    %6 = vector.broadcast %cst_5 : f32 to vector<8x32xf32>
    %7 = arith.mulf %5, %6 : vector<8x32xf32>
    %c0_6 = arith.constant 0 : index
    %c0_7 = arith.constant 0 : index
    %8 = vector.load %arg2[%c0_6, %c0_7] : memref<8x32xbf16, #tpu.memory_space<vmem>>, vector<8x32xbf16>
    %c0_8 = arith.constant 0 : index
    %c0_9 = arith.constant 0 : index
    %9 = vector.load %arg7[%c0_8, %c0_9] : memref<32x32xbf16, #tpu.memory_space<vmem>>, vector<32x32xbf16>
    %cst_10 = arith.constant dense<0.000000e+00> : vector<8x32xf32>
    %10 = tpu.matmul %8, %9, %cst_10 {dimension_numbers = #tpu.dot_dimension_numbers<[1], [0], [0], [1], [0, 0, 1, 1], [], []>} : vector<8x32xbf16>, vector<32x32xbf16>, vector<8x32xf32> -> vector<8x32xf32>
    %c0_11 = arith.constant 0 : index
    %c0_12 = arith.constant 0 : index
    %11 = vector.load %arg8[%c0_11, %c0_12] : memref<1x32xf32, #tpu.memory_space<vmem>>, vector<1x32xf32>
    %12 = vector.broadcast %11 : vector<1x32xf32> to vector<8x32xf32>
    %13 = arith.addf %10, %12 : vector<8x32xf32>
    %c0_13 = arith.constant 0 : index
    %c0_14 = arith.constant 0 : index
    %14 = vector.load %arg3[%c0_13, %c0_14] : memref<8x32xbf16, #tpu.memory_space<vmem>>, vector<8x32xbf16>
    %c0_15 = arith.constant 0 : index
    %c0_16 = arith.constant 0 : index
    %15 = vector.load %arg9[%c0_15, %c0_16] : memref<32x32xbf16, #tpu.memory_space<vmem>>, vector<32x32xbf16>
    %cst_17 = arith.constant dense<0.000000e+00> : vector<8x32xf32>
    %16 = tpu.matmul %14, %15, %cst_17 {dimension_numbers = #tpu.dot_dimension_numbers<[1], [0], [0], [1], [0, 0, 1, 1], [], []>} : vector<8x32xbf16>, vector<32x32xbf16>, vector<8x32xf32> -> vector<8x32xf32>
    %c0_18 = arith.constant 0 : index
    %c0_19 = arith.constant 0 : index
    %17 = vector.load %arg10[%c0_18, %c0_19] : memref<1x32xf32, #tpu.memory_space<vmem>>, vector<1x32xf32>
    %18 = vector.broadcast %17 : vector<1x32xf32> to vector<8x32xf32>
    %19 = arith.addf %16, %18 : vector<8x32xf32>
    %20 = arith.truncf %7 : vector<8x32xf32> to vector<8x32xbf16>
    %21 = arith.truncf %13 : vector<8x32xf32> to vector<8x32xbf16>
    %22 = arith.truncf %19 : vector<8x32xf32> to vector<8x32xbf16>
    %c0_20 = arith.constant 0 : index
    %c0_21 = arith.constant 0 : index
    %c0_22 = arith.constant 0 : index
    %23 = vector.load %arg4[%c0_20, %c0_21, %c0_22] : memref<1x8x8xi8, #tpu.memory_space<vmem>>, vector<1x8x8xi8>
    %24 = arith.extsi %23 : vector<1x8x8xi8> to vector<1x8x8xi32>
    %c0_i32 = arith.constant 0 : i32
    %25 = vector.broadcast %c0_i32 : i32 to vector<1x8x8xi32>
    %26 = arith.cmpi eq, %24, %25 : vector<1x8x8xi32>
    %cst_23 = arith.constant -1.000000e+30 : f32
    %cst_24 = arith.constant 0.000000e+00 : f32
    %27 = vector.broadcast %cst_23 : f32 to vector<1x8x8xf32>
    %28 = vector.broadcast %cst_24 : f32 to vector<1x8x8xf32>
    %29 = arith.select %26, %27, %28 : vector<1x8x8xi1>, vector<1x8x8xf32>
    %c0_25 = arith.constant 0 : index
    %c0_26 = arith.constant 0 : index
    %30 = vector.load %arg11[%c0_25, %c0_26] : memref<32x32xbf16, #tpu.memory_space<vmem>>, vector<32x32xbf16>
    %cst_27 = arith.constant 0.000000e+00 : f32
    %31 = vector.broadcast %cst_27 : f32 to vector<8x32xf32>
    %32 = vector.extract_strided_slice %20 {offsets = [0, 0], sizes = [8, 8], strides = [1, 1]} : vector<8x32xbf16> to vector<8x8xbf16>
    %33 = vector.shape_cast %32 : vector<8x8xbf16> to vector<1x8x8xbf16>
    %34 = vector.extract_strided_slice %21 {offsets = [0, 0], sizes = [8, 8], strides = [1, 1]} : vector<8x32xbf16> to vector<8x8xbf16>
    %35 = vector.shape_cast %34 : vector<8x8xbf16> to vector<1x8x8xbf16>
    %36 = vector.extract_strided_slice %22 {offsets = [0, 0], sizes = [8, 8], strides = [1, 1]} : vector<8x32xbf16> to vector<8x8xbf16>
    %37 = vector.shape_cast %36 : vector<8x8xbf16> to vector<1x8x8xbf16>
    "tpu.trace_start"() <{level = 10 : i32, message = "bqd,bkd->bqk"}> : () -> ()
    %cst_28 = arith.constant dense<0.000000e+00> : vector<1x8x8xf32>
    %38 = tpu.matmul %33, %35, %cst_28 {dimension_numbers = #tpu.dot_dimension_numbers<[2], [2], [1], [1], [0, 0, 0, 1, 1, 1], [0], [0]>} : vector<1x8x8xbf16>, vector<1x8x8xbf16>, vector<1x8x8xf32> -> vector<1x8x8xf32>
    "tpu.trace_stop"() : () -> ()
    %39 = arith.addf %38, %29 : vector<1x8x8xf32>
    %cst_29 = arith.constant dense<0xFF800000> : vector<1x8xf32>
    %40 = vector.multi_reduction <maximumf>, %39, %cst_29 [2] : vector<1x8x8xf32> to vector<1x8xf32>
    %41 = vector.shape_cast %40 : vector<1x8xf32> to vector<1x8x1xf32>
    %42 = vector.broadcast %41 : vector<1x8x1xf32> to vector<1x8x8xf32>
    %43 = arith.subf %39, %42 : vector<1x8x8xf32>
    %44 = math.exp %43 : vector<1x8x8xf32>
    %cst_30 = arith.constant dense<0.000000e+00> : vector<1x8xf32>
    %45 = vector.multi_reduction <add>, %44, %cst_30 [2] : vector<1x8x8xf32> to vector<1x8xf32>
    %46 = vector.shape_cast %45 : vector<1x8xf32> to vector<1x8x1xf32>
    %47 = tpu.reciprocal %46 {approx = true} : vector<1x8x1xf32> -> vector<1x8x1xf32>
    %48 = vector.broadcast %47 : vector<1x8x1xf32> to vector<1x8x8xf32>
    %49 = arith.mulf %44, %48 : vector<1x8x8xf32>
    %50 = arith.truncf %49 : vector<1x8x8xf32> to vector<1x8x8xbf16>
    "tpu.trace_start"() <{level = 10 : i32, message = "bqk,bkd->bqd"}> : () -> ()
    %cst_31 = arith.constant dense<0.000000e+00> : vector<1x8x8xf32>
    %51 = tpu.matmul %50, %37, %cst_31 {dimension_numbers = #tpu.dot_dimension_numbers<[2], [1], [1], [2], [0, 0, 0, 1, 1, 2], [0], [0]>} : vector<1x8x8xbf16>, vector<1x8x8xbf16>, vector<1x8x8xf32> -> vector<1x8x8xf32>
    "tpu.trace_stop"() : () -> ()
    %52 = vector.shape_cast %51 : vector<1x8x8xf32> to vector<8x8xf32>
    %53 = arith.truncf %52 : vector<8x8xf32> to vector<8x8xbf16>
    %54 = vector.extract_strided_slice %30 {offsets = [0, 0], sizes = [8, 32], strides = [1, 1]} : vector<32x32xbf16> to vector<8x32xbf16>
    %cst_32 = arith.constant dense<0.000000e+00> : vector<8x32xf32>
    %55 = tpu.matmul %53, %54, %cst_32 {dimension_numbers = #tpu.dot_dimension_numbers<[1], [0], [0], [1], [0, 0, 1, 1], [], []>} : vector<8x8xbf16>, vector<8x32xbf16>, vector<8x32xf32> -> vector<8x32xf32>
    %56 = arith.addf %31, %55 : vector<8x32xf32>
    %57 = vector.extract_strided_slice %20 {offsets = [0, 8], sizes = [8, 8], strides = [1, 1]} : vector<8x32xbf16> to vector<8x8xbf16>
    %58 = vector.shape_cast %57 : vector<8x8xbf16> to vector<1x8x8xbf16>
    %59 = vector.extract_strided_slice %21 {offsets = [0, 8], sizes = [8, 8], strides = [1, 1]} : vector<8x32xbf16> to vector<8x8xbf16>
    %60 = vector.shape_cast %59 : vector<8x8xbf16> to vector<1x8x8xbf16>
    %61 = vector.extract_strided_slice %22 {offsets = [0, 8], sizes = [8, 8], strides = [1, 1]} : vector<8x32xbf16> to vector<8x8xbf16>
    %62 = vector.shape_cast %61 : vector<8x8xbf16> to vector<1x8x8xbf16>
    "tpu.trace_start"() <{level = 10 : i32, message = "bqd,bkd->bqk"}> : () -> ()
    %cst_33 = arith.constant dense<0.000000e+00> : vector<1x8x8xf32>
    %63 = tpu.matmul %58, %60, %cst_33 {dimension_numbers = #tpu.dot_dimension_numbers<[2], [2], [1], [1], [0, 0, 0, 1, 1, 1], [0], [0]>} : vector<1x8x8xbf16>, vector<1x8x8xbf16>, vector<1x8x8xf32> -> vector<1x8x8xf32>
    "tpu.trace_stop"() : () -> ()
    %64 = arith.addf %63, %29 : vector<1x8x8xf32>
    %cst_34 = arith.constant dense<0xFF800000> : vector<1x8xf32>
    %65 = vector.multi_reduction <maximumf>, %64, %cst_34 [2] : vector<1x8x8xf32> to vector<1x8xf32>
    %66 = vector.shape_cast %65 : vector<1x8xf32> to vector<1x8x1xf32>
    %67 = vector.broadcast %66 : vector<1x8x1xf32> to vector<1x8x8xf32>
    %68 = arith.subf %64, %67 : vector<1x8x8xf32>
    %69 = math.exp %68 : vector<1x8x8xf32>
    %cst_35 = arith.constant dense<0.000000e+00> : vector<1x8xf32>
    %70 = vector.multi_reduction <add>, %69, %cst_35 [2] : vector<1x8x8xf32> to vector<1x8xf32>
    %71 = vector.shape_cast %70 : vector<1x8xf32> to vector<1x8x1xf32>
    %72 = tpu.reciprocal %71 {approx = true} : vector<1x8x1xf32> -> vector<1x8x1xf32>
    %73 = vector.broadcast %72 : vector<1x8x1xf32> to vector<1x8x8xf32>
    %74 = arith.mulf %69, %73 : vector<1x8x8xf32>
    %75 = arith.truncf %74 : vector<1x8x8xf32> to vector<1x8x8xbf16>
    "tpu.trace_start"() <{level = 10 : i32, message = "bqk,bkd->bqd"}> : () -> ()
    %cst_36 = arith.constant dense<0.000000e+00> : vector<1x8x8xf32>
    %76 = tpu.matmul %75, %62, %cst_36 {dimension_numbers = #tpu.dot_dimension_numbers<[2], [1], [1], [2], [0, 0, 0, 1, 1, 2], [0], [0]>} : vector<1x8x8xbf16>, vector<1x8x8xbf16>, vector<1x8x8xf32> -> vector<1x8x8xf32>
    "tpu.trace_stop"() : () -> ()
    %77 = vector.shape_cast %76 : vector<1x8x8xf32> to vector<8x8xf32>
    %78 = arith.truncf %77 : vector<8x8xf32> to vector<8x8xbf16>
    %79 = vector.extract_strided_slice %30 {offsets = [8, 0], sizes = [8, 32], strides = [1, 1]} : vector<32x32xbf16> to vector<8x32xbf16>
    %cst_37 = arith.constant dense<0.000000e+00> : vector<8x32xf32>
    %80 = tpu.matmul %78, %79, %cst_37 {dimension_numbers = #tpu.dot_dimension_numbers<[1], [0], [0], [1], [0, 0, 1, 1], [], []>} : vector<8x8xbf16>, vector<8x32xbf16>, vector<8x32xf32> -> vector<8x32xf32>
    %81 = arith.addf %56, %80 : vector<8x32xf32>
    %82 = vector.extract_strided_slice %20 {offsets = [0, 16], sizes = [8, 8], strides = [1, 1]} : vector<8x32xbf16> to vector<8x8xbf16>
    %83 = vector.shape_cast %82 : vector<8x8xbf16> to vector<1x8x8xbf16>
    %84 = vector.extract_strided_slice %21 {offsets = [0, 16], sizes = [8, 8], strides = [1, 1]} : vector<8x32xbf16> to vector<8x8xbf16>
    %85 = vector.shape_cast %84 : vector<8x8xbf16> to vector<1x8x8xbf16>
    %86 = vector.extract_strided_slice %22 {offsets = [0, 16], sizes = [8, 8], strides = [1, 1]} : vector<8x32xbf16> to vector<8x8xbf16>
    %87 = vector.shape_cast %86 : vector<8x8xbf16> to vector<1x8x8xbf16>
    "tpu.trace_start"() <{level = 10 : i32, message = "bqd,bkd->bqk"}> : () -> ()
    %cst_38 = arith.constant dense<0.000000e+00> : vector<1x8x8xf32>
    %88 = tpu.matmul %83, %85, %cst_38 {dimension_numbers = #tpu.dot_dimension_numbers<[2], [2], [1], [1], [0, 0, 0, 1, 1, 1], [0], [0]>} : vector<1x8x8xbf16>, vector<1x8x8xbf16>, vector<1x8x8xf32> -> vector<1x8x8xf32>
    "tpu.trace_stop"() : () -> ()
    %89 = arith.addf %88, %29 : vector<1x8x8xf32>
    %cst_39 = arith.constant dense<0xFF800000> : vector<1x8xf32>
    %90 = vector.multi_reduction <maximumf>, %89, %cst_39 [2] : vector<1x8x8xf32> to vector<1x8xf32>
    %91 = vector.shape_cast %90 : vector<1x8xf32> to vector<1x8x1xf32>
    %92 = vector.broadcast %91 : vector<1x8x1xf32> to vector<1x8x8xf32>
    %93 = arith.subf %89, %92 : vector<1x8x8xf32>
    %94 = math.exp %93 : vector<1x8x8xf32>
    %cst_40 = arith.constant dense<0.000000e+00> : vector<1x8xf32>
    %95 = vector.multi_reduction <add>, %94, %cst_40 [2] : vector<1x8x8xf32> to vector<1x8xf32>
    %96 = vector.shape_cast %95 : vector<1x8xf32> to vector<1x8x1xf32>
    %97 = tpu.reciprocal %96 {approx = true} : vector<1x8x1xf32> -> vector<1x8x1xf32>
    %98 = vector.broadcast %97 : vector<1x8x1xf32> to vector<1x8x8xf32>
    %99 = arith.mulf %94, %98 : vector<1x8x8xf32>
    %100 = arith.truncf %99 : vector<1x8x8xf32> to vector<1x8x8xbf16>
    "tpu.trace_start"() <{level = 10 : i32, message = "bqk,bkd->bqd"}> : () -> ()
    %cst_41 = arith.constant dense<0.000000e+00> : vector<1x8x8xf32>
    %101 = tpu.matmul %100, %87, %cst_41 {dimension_numbers = #tpu.dot_dimension_numbers<[2], [1], [1], [2], [0, 0, 0, 1, 1, 2], [0], [0]>} : vector<1x8x8xbf16>, vector<1x8x8xbf16>, vector<1x8x8xf32> -> vector<1x8x8xf32>
    "tpu.trace_stop"() : () -> ()
    %102 = vector.shape_cast %101 : vector<1x8x8xf32> to vector<8x8xf32>
    %103 = arith.truncf %102 : vector<8x8xf32> to vector<8x8xbf16>
    %104 = vector.extract_strided_slice %30 {offsets = [16, 0], sizes = [8, 32], strides = [1, 1]} : vector<32x32xbf16> to vector<8x32xbf16>
    %cst_42 = arith.constant dense<0.000000e+00> : vector<8x32xf32>
    %105 = tpu.matmul %103, %104, %cst_42 {dimension_numbers = #tpu.dot_dimension_numbers<[1], [0], [0], [1], [0, 0, 1, 1], [], []>} : vector<8x8xbf16>, vector<8x32xbf16>, vector<8x32xf32> -> vector<8x32xf32>
    %106 = arith.addf %81, %105 : vector<8x32xf32>
    %107 = vector.extract_strided_slice %20 {offsets = [0, 24], sizes = [8, 8], strides = [1, 1]} : vector<8x32xbf16> to vector<8x8xbf16>
    %108 = vector.shape_cast %107 : vector<8x8xbf16> to vector<1x8x8xbf16>
    %109 = vector.extract_strided_slice %21 {offsets = [0, 24], sizes = [8, 8], strides = [1, 1]} : vector<8x32xbf16> to vector<8x8xbf16>
    %110 = vector.shape_cast %109 : vector<8x8xbf16> to vector<1x8x8xbf16>
    %111 = vector.extract_strided_slice %22 {offsets = [0, 24], sizes = [8, 8], strides = [1, 1]} : vector<8x32xbf16> to vector<8x8xbf16>
    %112 = vector.shape_cast %111 : vector<8x8xbf16> to vector<1x8x8xbf16>
    "tpu.trace_start"() <{level = 10 : i32, message = "bqd,bkd->bqk"}> : () -> ()
    %cst_43 = arith.constant dense<0.000000e+00> : vector<1x8x8xf32>
    %113 = tpu.matmul %108, %110, %cst_43 {dimension_numbers = #tpu.dot_dimension_numbers<[2], [2], [1], [1], [0, 0, 0, 1, 1, 1], [0], [0]>} : vector<1x8x8xbf16>, vector<1x8x8xbf16>, vector<1x8x8xf32> -> vector<1x8x8xf32>
    "tpu.trace_stop"() : () -> ()
    %114 = arith.addf %113, %29 : vector<1x8x8xf32>
    %cst_44 = arith.constant dense<0xFF800000> : vector<1x8xf32>
    %115 = vector.multi_reduction <maximumf>, %114, %cst_44 [2] : vector<1x8x8xf32> to vector<1x8xf32>
    %116 = vector.shape_cast %115 : vector<1x8xf32> to vector<1x8x1xf32>
    %117 = vector.broadcast %116 : vector<1x8x1xf32> to vector<1x8x8xf32>
    %118 = arith.subf %114, %117 : vector<1x8x8xf32>
    %119 = math.exp %118 : vector<1x8x8xf32>
    %cst_45 = arith.constant dense<0.000000e+00> : vector<1x8xf32>
    %120 = vector.multi_reduction <add>, %119, %cst_45 [2] : vector<1x8x8xf32> to vector<1x8xf32>
    %121 = vector.shape_cast %120 : vector<1x8xf32> to vector<1x8x1xf32>
    %122 = tpu.reciprocal %121 {approx = true} : vector<1x8x1xf32> -> vector<1x8x1xf32>
    %123 = vector.broadcast %122 : vector<1x8x1xf32> to vector<1x8x8xf32>
    %124 = arith.mulf %119, %123 : vector<1x8x8xf32>
    %125 = arith.truncf %124 : vector<1x8x8xf32> to vector<1x8x8xbf16>
    "tpu.trace_start"() <{level = 10 : i32, message = "bqk,bkd->bqd"}> : () -> ()
    %cst_46 = arith.constant dense<0.000000e+00> : vector<1x8x8xf32>
    %126 = tpu.matmul %125, %112, %cst_46 {dimension_numbers = #tpu.dot_dimension_numbers<[2], [1], [1], [2], [0, 0, 0, 1, 1, 2], [0], [0]>} : vector<1x8x8xbf16>, vector<1x8x8xbf16>, vector<1x8x8xf32> -> vector<1x8x8xf32>
    "tpu.trace_stop"() : () -> ()
    %127 = vector.shape_cast %126 : vector<1x8x8xf32> to vector<8x8xf32>
    %128 = arith.truncf %127 : vector<8x8xf32> to vector<8x8xbf16>
    %129 = vector.extract_strided_slice %30 {offsets = [24, 0], sizes = [8, 32], strides = [1, 1]} : vector<32x32xbf16> to vector<8x32xbf16>
    %cst_47 = arith.constant dense<0.000000e+00> : vector<8x32xf32>
    %130 = tpu.matmul %128, %129, %cst_47 {dimension_numbers = #tpu.dot_dimension_numbers<[1], [0], [0], [1], [0, 0, 1, 1], [], []>} : vector<8x8xbf16>, vector<8x32xbf16>, vector<8x32xf32> -> vector<8x32xf32>
    %131 = arith.addf %106, %130 : vector<8x32xf32>
    %c0_48 = arith.constant 0 : index
    %c0_49 = arith.constant 0 : index
    %132 = vector.load %arg12[%c0_48, %c0_49] : memref<1x32xf32, #tpu.memory_space<vmem>>, vector<1x32xf32>
    %133 = vector.broadcast %132 : vector<1x32xf32> to vector<8x32xf32>
    %134 = arith.addf %131, %133 : vector<8x32xf32>
    %c0_50 = arith.constant 0 : index
    %c0_51 = arith.constant 0 : index
    %135 = vector.load %arg13[%c0_50, %c0_51] : memref<8x32xf32, #tpu.memory_space<vmem>>, vector<8x32xf32>
    tpu.vector_store %arg13[%c0_50, %c0_51], %134 {strides = array<i32>} : memref<8x32xf32, #tpu.memory_space<vmem>>, vector<8x32xf32>,
    return
  }
  func.func @transform_0(%arg0: i32) -> (i32, i32) {
    %c0_i32 = arith.constant 0 : i32
    %c0_i32_0 = arith.constant 0 : i32
    return %arg0, %c0_i32 : i32, i32
  }
  func.func @transform_1(%arg0: i32) -> (i32, i32) {
    %c0_i32 = arith.constant 0 : i32
    %c0_i32_0 = arith.constant 0 : i32
    return %arg0, %c0_i32 : i32, i32
  }
  func.func @transform_2(%arg0: i32) -> (i32, i32) {
    %c0_i32 = arith.constant 0 : i32
    %c0_i32_0 = arith.constant 0 : i32
    return %arg0, %c0_i32 : i32, i32
  }
  func.func @transform_3(%arg0: i32) -> (i32, i32, i32) {
    %c0_i32 = arith.constant 0 : i32
    %c0_i32_0 = arith.constant 0 : i32
    %c0_i32_1 = arith.constant 0 : i32
    return %arg0, %c0_i32, %c0_i32_0 : i32, i32, i32
  }
  func.func @transform_4(%arg0: i32) -> (i32, i32) {
    %c0_i32 = arith.constant 0 : i32
    %c0_i32_0 = arith.constant 0 : i32
    %c0_i32_1 = arith.constant 0 : i32
    return %c0_i32, %c0_i32_0 : i32, i32
  }
  func.func @transform_5(%arg0: i32) -> (i32, i32) {
    %c0_i32 = arith.constant 0 : i32
    %c0_i32_0 = arith.constant 0 : i32
    %c0_i32_1 = arith.constant 0 : i32
    return %c0_i32, %c0_i32_0 : i32, i32
  }
  func.func @transform_6(%arg0: i32) -> (i32, i32) {
    %c0_i32 = arith.constant 0 : i32
    %c0_i32_0 = arith.constant 0 : i32
    %c0_i32_1 = arith.constant 0 : i32
    return %c0_i32, %c0_i32_0 : i32, i32
  }
  func.func @transform_7(%arg0: i32) -> (i32, i32) {
    %c0_i32 = arith.constant 0 : i32
    %c0_i32_0 = arith.constant 0 : i32
    %c0_i32_1 = arith.constant 0 : i32
    return %c0_i32, %c0_i32_0 : i32, i32
  }
  func.func @transform_8(%arg0: i32) -> (i32, i32) {
    %c0_i32 = arith.constant 0 : i32
    %c0_i32_0 = arith.constant 0 : i32
    %c0_i32_1 = arith.constant 0 : i32
    return %c0_i32, %c0_i32_0 : i32, i32
  }
  func.func @transform_9(%arg0: i32) -> (i32, i32) {
    %c0_i32 = arith.constant 0 : i32
    %c0_i32_0 = arith.constant 0 : i32
    %c0_i32_1 = arith.constant 0 : i32
    return %c0_i32, %c0_i32_0 : i32, i32
  }
  func.func @transform_10(%arg0: i32) -> (i32, i32) {
    %c0_i32 = arith.constant 0 : i32
    %c0_i32_0 = arith.constant 0 : i32
    %c0_i32_1 = arith.constant 0 : i32
    return %c0_i32, %c0_i32_0 : i32, i32
  }
  func.func @transform_11(%arg0: i32) -> (i32, i32) {
    %c0_i32 = arith.constant 0 : i32
    %c0_i32_0 = arith.constant 0 : i32
    %c0_i32_1 = arith.constant 0 : i32
    return %c0_i32, %c0_i32_0 : i32, i32
  }
  func.func @transform_12(%arg0: i32) -> (i32, i32) {
    %c0_i32 = arith.constant 0 : i32
    %c0_i32_0 = arith.constant 0 : i32
    return %arg0, %c0_i32 : i32, i32
  }
}

module attributes {stable_mosaic.version = 11 : i64} {
  func.func @_mha_kernel(%arg0: i32, %arg1: memref<8x32xbf16, #tpu.memory_space<vmem>>, %arg2: memref<8x32xbf16, #tpu.memory_space<vmem>>, %arg3: memref<8x32xbf16, #tpu.memory_space<vmem>>, %arg4: memref<1x8x8xi8, #tpu.memory_space<vmem>>, %arg5: memref<32x32xbf16, #tpu.memory_space<vmem>>, %arg6: memref<1x32xf32, #tpu.memory_space<vmem>>, %arg7: memref<32x32xbf16, #tpu.memory_space<vmem>>, %arg8: memref<1x32xf32, #tpu.memory_space<vmem>>, %arg9: memref<32x32xbf16, #tpu.memory_space<vmem>>, %arg10: memref<1x32xf32, #tpu.memory_space<vmem>>, %arg11: memref<32x32xbf16, #tpu.memory_space<vmem>>, %arg12: memref<1x32xf32, #tpu.memory_space<vmem>>, %arg13: memref<8x32xf32, #tpu.memory_space<vmem>>) attributes {dimension_semantics = [#tpu.dimension_semantics<parallel>], iteration_bounds = array<i64: 2>, scalar_prefetch = 0 : i64, scratch_operands = 0 : i64, tpu.core_type = #tpu.core_type<tc>, window_params = [{transform_indices = @transform_0, window_bounds = array<i64: 8, 32>}, {transform_indices = @transform_1, window_bounds = array<i64: 8, 32>}, {transform_indices = @transform_2, window_bounds = array<i64: 8, 32>}, {transform_indices = @transform_3, window_bounds = array<i64: 1, 8, 8>}, {pipeline_mode = #tpu.pipeline_mode<synchronous>, transform_indices = @transform_4, window_bounds = array<i64: 32, 32>}, {pipeline_mode = #tpu.pipeline_mode<synchronous>, transform_indices = @transform_5, window_bounds = array<i64: 1, 32>}, {pipeline_mode = #tpu.pipeline_mode<synchronous>, transform_indices = @transform_6, window_bounds = array<i64: 32, 32>}, {pipeline_mode = #tpu.pipeline_mode<synchronous>, transform_indices = @transform_7, window_bounds = array<i64: 1, 32>}, {pipeline_mode = #tpu.pipeline_mode<synchronous>, transform_indices = @transform_8, window_bounds = array<i64: 32, 32>}, {pipeline_mode = #tpu.pipeline_mode<synchronous>, transform_indices = @transform_9, window_bounds = array<i64: 1, 32>}, {pipeline_mode = #tpu.pipeline_mode<synchronous>, transform_indices = @transform_10, window_bounds = array<i64: 32, 32>}, {pipeline_mode = #tpu.pipeline_mode<synchronous>, transform_indices = @transform_11, window_bounds = array<i64: 1, 32>}, {transform_indices = @transform_12, window_bounds = array<i64: 8, 32>}]} {
    %c0 = arith.constant 0 : index
    %c0_0 = arith.constant 0 : index
    %0 = vector.load %arg1[%c0, %c0_0] : memref<8x32xbf16, #tpu.memory_space<vmem>>, vector<8x32xbf16>
    %c0_1 = arith.constant 0 : index
    %c0_2 = arith.constant 0 : index
    %1 = vector.load %arg5[%c0_1, %c0_2] : memref<32x32xbf16, #tpu.memory_space<vmem>>, vector<32x32xbf16>
    %cst = arith.constant dense<0.000000e+00> : vector<8x32xf32>
    %2 = tpu.matmul %0, %1, %cst {dimension_numbers = #tpu.dot_dimension_numbers<[1], [0], [0], [1], [0, 0, 1, 1], [], []>} : vector<8x32xbf16>, vector<32x32xbf16>, vector<8x32xf32> -> vector<8x32xf32>
    %c0_3 = arith.constant 0 : index
    %c0_4 = arith.constant 0 : index
    %3 = vector.load %arg6[%c0_3, %c0_4] : memref<1x32xf32, #tpu.memory_space<vmem>>, vector<1x32xf32>
    %4 = vector.broadcast %3 : vector<1x32xf32> to vector<8x32xf32>
    %5 = arith.addf %2, %4 : vector<8x32xf32>
    %cst_5 = arith.constant 0.353553385 : f32
    %6 = vector.broadcast %cst_5 : f32 to vector<8x32xf32>
    %7 = arith.mulf %5, %6 : vector<8x32xf32>
    %c0_6 = arith.constant 0 : index
    %c0_7 = arith.constant 0 : index
    %8 = vector.load %arg2[%c0_6, %c0_7] : memref<8x32xbf16, #tpu.memory_space<vmem>>, vector<8x32xbf16>
    %c0_8 = arith.constant 0 : index
    %c0_9 = arith.constant 0 : index
    %9 = vector.load %arg7[%c0_8, %c0_9] : memref<32x32xbf16, #tpu.memory_space<vmem>>, vector<32x32xbf16>
    %cst_10 = arith.constant dense<0.000000e+00> : vector<8x32xf32>
    %10 = tpu.matmul %8, %9, %cst_10 {dimension_numbers = #tpu.dot_dimension_numbers<[1], [0], [0], [1], [0, 0, 1, 1], [], []>} : vector<8x32xbf16>, vector<32x32xbf16>, vector<8x32xf32> -> vector<8x32xf32>
    %c0_11 = arith.constant 0 : index
    %c0_12 = arith.constant 0 : index
    %11 = vector.load %arg8[%c0_11, %c0_12] : memref<1x32xf32, #tpu.memory_space<vmem>>, vector<1x32xf32>
    %12 = vector.broadcast %11 : vector<1x32xf32> to vector<8x32xf32>
    %13 = arith.addf %10, %12 : vector<8x32xf32>
    %c0_13 = arith.constant 0 : index
    %c0_14 = arith.constant 0 : index
    %14 = vector.load %arg3[%c0_13, %c0_14] : memref<8x32xbf16, #tpu.memory_space<vmem>>, vector<8x32xbf16>
    %c0_15 = arith.constant 0 : index
    %c0_16 = arith.constant 0 : index
    %15 = vector.load %arg9[%c0_15, %c0_16] : memref<32x32xbf16, #tpu.memory_space<vmem>>, vector<32x32xbf16>
    %cst_17 = arith.constant dense<0.000000e+00> : vector<8x32xf32>
    %16 = tpu.matmul %14, %15, %cst_17 {dimension_numbers = #tpu.dot_dimension_numbers<[1], [0], [0], [1], [0, 0, 1, 1], [], []>} : vector<8x32xbf16>, vector<32x32xbf16>, vector<8x32xf32> -> vector<8x32xf32>
    %c0_18 = arith.constant 0 : index
    %c0_19 = arith.constant 0 : index
    %17 = vector.load %arg10[%c0_18, %c0_19] : memref<1x32xf32, #tpu.memory_space<vmem>>, vector<1x32xf32>
    %18 = vector.broadcast %17 : vector<1x32xf32> to vector<8x32xf32>
    %19 = arith.addf %16, %18 : vector<8x32xf32>
    %20 = arith.truncf %7 : vector<8x32xf32> to vector<8x32xbf16>
    %21 = arith.truncf %13 : vector<8x32xf32> to vector<8x32xbf16>
    %22 = arith.truncf %19 : vector<8x32xf32> to vector<8x32xbf16>
    %c0_20 = arith.constant 0 : index
    %c0_21 = arith.constant 0 : index
    %c0_22 = arith.constant 0 : index
    %23 = vector.load %arg4[%c0_20, %c0_21, %c0_22] : memref<1x8x8xi8, #tpu.memory_space<vmem>>, vector<1x8x8xi8>
    %24 = arith.extsi %23 : vector<1x8x8xi8> to vector<1x8x8xi32>
    %c0_i32 = arith.constant 0 : i32
    %25 = vector.broadcast %c0_i32 : i32 to vector<1x8x8xi32>
    %26 = arith.cmpi eq, %24, %25 : vector<1x8x8xi32>
    %cst_23 = arith.constant -1.000000e+30 : f32
    %cst_24 = arith.constant 0.000000e+00 : f32
    %27 = vector.broadcast %cst_23 : f32 to vector<1x8x8xf32>
    %28 = vector.broadcast %cst_24 : f32 to vector<1x8x8xf32>
    %29 = arith.select %26, %27, %28 : vector<1x8x8xi1>, vector<1x8x8xf32>
    %c0_25 = arith.constant 0 : index
    %c0_26 = arith.constant 0 : index
    %30 = vector.load %arg11[%c0_25, %c0_26] : memref<32x32xbf16, #tpu.memory_space<vmem>>, vector<32x32xbf16>
    %cst_27 = arith.constant 0.000000e+00 : f32
    %31 = vector.broadcast %cst_27 : f32 to vector<8x32xf32>
    %32 = vector.extract_strided_slice %20 {offsets = [0, 0], sizes = [8, 8], strides = [1, 1]} : vector<8x32xbf16> to vector<8x8xbf16>
    %33 = vector.shape_cast %32 : vector<8x8xbf16> to vector<1x8x8xbf16>
    %34 = vector.extract_strided_slice %21 {offsets = [0, 0], sizes = [8, 8], strides = [1, 1]} : vector<8x32xbf16> to vector<8x8xbf16>
    %35 = vector.shape_cast %34 : vector<8x8xbf16> to vector<1x8x8xbf16>
    %36 = vector.extract_strided_slice %22 {offsets = [0, 0], sizes = [8, 8], strides = [1, 1]} : vector<8x32xbf16> to vector<8x8xbf16>
    %37 = vector.shape_cast %36 : vector<8x8xbf16> to vector<1x8x8xbf16>
    "tpu.trace_start"() <{level = 10 : i32, message = "bqd,bkd->bqk"}> : () -> ()
    %cst_28 = arith.constant dense<0.000000e+00> : vector<1x8x8xf32>
    %38 = tpu.matmul %33, %35, %cst_28 {dimension_numbers = #tpu.dot_dimension_numbers<[2], [2], [1], [1], [0, 0, 0, 1, 1, 1], [0], [0]>} : vector<1x8x8xbf16>, vector<1x8x8xbf16>, vector<1x8x8xf32> -> vector<1x8x8xf32>
    "tpu.trace_stop"() : () -> ()
    %39 = arith.addf %38, %29 : vector<1x8x8xf32>
    %cst_29 = arith.constant dense<0xFF800000> : vector<1x8xf32>
    %40 = vector.multi_reduction <maximumf>, %39, %cst_29 [2] : vector<1x8x8xf32> to vector<1x8xf32>
    %41 = vector.shape_cast %40 : vector<1x8xf32> to vector<1x8x1xf32>
    %42 = vector.broadcast %41 : vector<1x8x1xf32> to vector<1x8x8xf32>
    %43 = arith.subf %39, %42 : vector<1x8x8xf32>
    %44 = math.exp %43 : vector<1x8x8xf32>
    %cst_30 = arith.constant dense<0.000000e+00> : vector<1x8xf32>
    %45 = vector.multi_reduction <add>, %44, %cst_30 [2] : vector<1x8x8xf32> to vector<1x8xf32>
    %46 = vector.shape_cast %45 : vector<1x8xf32> to vector<1x8x1xf32>
    %47 = tpu.reciprocal %46 {approx = true} : vector<1x8x1xf32> -> vector<1x8x1xf32>
    %48 = vector.broadcast %47 : vector<1x8x1xf32> to vector<1x8x8xf32>
    %49 = arith.mulf %44, %48 : vector<1x8x8xf32>
    %50 = arith.truncf %49 : vector<1x8x8xf32> to vector<1x8x8xbf16>
    "tpu.trace_start"() <{level = 10 : i32, message = "bqk,bkd->bqd"}> : () -> ()
    %cst_31 = arith.constant dense<0.000000e+00> : vector<1x8x8xf32>
    %51 = tpu.matmul %50, %37, %cst_31 {dimension_numbers = #tpu.dot_dimension_numbers<[2], [1], [1], [2], [0, 0, 0, 1, 1, 2], [0], [0]>} : vector<1x8x8xbf16>, vector<1x8x8xbf16>, vector<1x8x8xf32> -> vector<1x8x8xf32>
    "tpu.trace_stop"() : () -> ()
    %52 = vector.shape_cast %51 : vector<1x8x8xf32> to vector<8x8xf32>
    %53 = arith.truncf %52 : vector<8x8xf32> to vector<8x8xbf16>
    %54 = vector.extract_strided_slice %30 {offsets = [0, 0], sizes = [8, 32], strides = [1, 1]} : vector<32x32xbf16> to vector<8x32xbf16>
    %cst_32 = arith.constant dense<0.000000e+00> : vector<8x32xf32>
    %55 = tpu.matmul %53, %54, %cst_32 {dimension_numbers = #tpu.dot_dimension_numbers<[1], [0], [0], [1], [0, 0, 1, 1], [], []>} : vector<8x8xbf16>, vector<8x32xbf16>, vector<8x32xf32> -> vector<8x32xf32>
    %56 = arith.addf %31, %55 : vector<8x32xf32>
    %57 = vector.extract_strided_slice %20 {offsets = [0, 8], sizes = [8, 8], strides = [1, 1]} : vector<8x32xbf16> to vector<8x8xbf16>
    %58 = vector.shape_cast %57 : vector<8x8xbf16> to vector<1x8x8xbf16>
    %59 = vector.extract_strided_slice %21 {offsets = [0, 8], sizes = [8, 8], strides = [1, 1]} : vector<8x32xbf16> to vector<8x8xbf16>
    %60 = vector.shape_cast %59 : vector<8x8xbf16> to vector<1x8x8xbf16>
    %61 = vector.extract_strided_slice %22 {offsets = [0, 8], sizes = [8, 8], strides = [1, 1]} : vector<8x32xbf16> to vector<8x8xbf16>
    %62 = vector.shape_cast %61 : vector<8x8xbf16> to vector<1x8x8xbf16>
    "tpu.trace_start"() <{level = 10 : i32, message = "bqd,bkd->bqk"}> : () -> ()
    %cst_33 = arith.constant dense<0.000000e+00> : vector<1x8x8xf32>
    %63 = tpu.matmul %58, %60, %cst_33 {dimension_numbers = #tpu.dot_dimension_numbers<[2], [2], [1], [1], [0, 0, 0, 1, 1, 1], [0], [0]>} : vector<1x8x8xbf16>, vector<1x8x8xbf16>, vector<1x8x8xf32> -> vector<1x8x8xf32>
    "tpu.trace_stop"() : () -> ()
    %64 = arith.addf %63, %29 : vector<1x8x8xf32>
    %cst_34 = arith.constant dense<0xFF800000> : vector<1x8xf32>
    %65 = vector.multi_reduction <maximumf>, %64, %cst_34 [2] : vector<1x8x8xf32> to vector<1x8xf32>
    %66 = vector.shape_cast %65 : vector<1x8xf32> to vector<1x8x1xf32>
    %67 = vector.broadcast %66 : vector<1x8x1xf32> to vector<1x8x8xf32>
    %68 = arith.subf %64, %67 : vector<1x8x8xf32>
    %69 = math.exp %68 : vector<1x8x8xf32>
    %cst_35 = arith.constant dense<0.000000e+00> : vector<1x8xf32>
    %70 = vector.multi_reduction <add>, %69, %cst_35 [2] : vector<1x8x8xf32> to vector<1x8xf32>
    %71 = vector.shape_cast %70 : vector<1x8xf32> to vector<1x8x1xf32>
    %72 = tpu.reciprocal %71 {approx = true} : vector<1x8x1xf32> -> vector<1x8x1xf32>
    %73 = vector.broadcast %72 : vector<1x8x1xf32> to vector<1x8x8xf32>
    %74 = arith.mulf %69, %73 : vector<1x8x8xf32>
    %75 = arith.truncf %74 : vector<1x8x8xf32> to vector<1x8x8xbf16>
    "tpu.trace_start"() <{level = 10 : i32, message = "bqk,bkd->bqd"}> : () -> ()
    %cst_36 = arith.constant dense<0.000000e+00> : vector<1x8x8xf32>
    %76 = tpu.matmul %75, %62, %cst_36 {dimension_numbers = #tpu.dot_dimension_numbers<[2], [1], [1], [2], [0, 0, 0, 1, 1, 2], [0], [0]>} : vector<1x8x8xbf16>, vector<1x8x8xbf16>, vector<1x8x8xf32> -> vector<1x8x8xf32>
    "tpu.trace_stop"() : () -> ()
    %77 = vector.shape_cast %76 : vector<1x8x8xf32> to vector<8x8xf32>
    %78 = arith.truncf %77 : vector<8x8xf32> to vector<8x8xbf16>
    %79 = vector.extract_strided_slice %30 {offsets = [8, 0], sizes = [8, 32], strides = [1, 1]} : vector<32x32xbf16> to vector<8x32xbf16>
    %cst_37 = arith.constant dense<0.000000e+00> : vector<8x32xf32>
    %80 = tpu.matmul %78, %79, %cst_37 {dimension_numbers = #tpu.dot_dimension_numbers<[1], [0], [0], [1], [0, 0, 1, 1], [], []>} : vector<8x8xbf16>, vector<8x32xbf16>, vector<8x32xf32> -> vector<8x32xf32>
    %81 = arith.addf %56, %80 : vector<8x32xf32>
    %82 = vector.extract_strided_slice %20 {offsets = [0, 16], sizes = [8, 8], strides = [1, 1]} : vector<8x32xbf16> to vector<8x8xbf16>
    %83 = vector.shape_cast %82 : vector<8x8xbf16> to vector<1x8x8xbf16>
    %84 = vector.extract_strided_slice %21 {offsets = [0, 16], sizes = [8, 8], strides = [1, 1]} : vector<8x32xbf16> to vector<8x8xbf16>
    %85 = vector.shape_cast %84 : vector<8x8xbf16> to vector<1x8x8xbf16>
    %86 = vector.extract_strided_slice %22 {offsets = [0, 16], sizes = [8, 8], strides = [1, 1]} : vector<8x32xbf16> to vector<8x8xbf16>
    %87 = vector.shape_cast %86 : vector<8x8xbf16> to vector<1x8x8xbf16>
    "tpu.trace_start"() <{level = 10 : i32, message = "bqd,bkd->bqk"}> : () -> ()
    %cst_38 = arith.constant dense<0.000000e+00> : vector<1x8x8xf32>
    %88 = tpu.matmul %83, %85, %cst_38 {dimension_numbers = #tpu.dot_dimension_numbers<[2], [2], [1], [1], [0, 0, 0, 1, 1, 1], [0], [0]>} : vector<1x8x8xbf16>, vector<1x8x8xbf16>, vector<1x8x8xf32> -> vector<1x8x8xf32>
    "tpu.trace_stop"() : () -> ()
    %89 = arith.addf %88, %29 : vector<1x8x8xf32>
    %cst_39 = arith.constant dense<0xFF800000> : vector<1x8xf32>
    %90 = vector.multi_reduction <maximumf>, %89, %cst_39 [2] : vector<1x8x8xf32> to vector<1x8xf32>
    %91 = vector.shape_cast %90 : vector<1x8xf32> to vector<1x8x1xf32>
    %92 = vector.broadcast %91 : vector<1x8x1xf32> to vector<1x8x8xf32>
    %93 = arith.subf %89, %92 : vector<1x8x8xf32>
    %94 = math.exp %93 : vector<1x8x8xf32>
    %cst_40 = arith.constant dense<0.000000e+00> : vector<1x8xf32>
    %95 = vector.multi_reduction <add>, %94, %cst_40 [2] : vector<1x8x8xf32> to vector<1x8xf32>
    %96 = vector.shape_cast %95 : vector<1x8xf32> to vector<1x8x1xf32>
    %97 = tpu.reciprocal %96 {approx = true} : vector<1x8x1xf32> -> vector<1x8x1xf32>
    %98 = vector.broadcast %97 : vector<1x8x1xf32> to vector<1x8x8xf32>
    %99 = arith.mulf %94, %98 : vector<1x8x8xf32>
    %100 = arith.truncf %99 : vector<1x8x8xf32> to vector<1x8x8xbf16>
    "tpu.trace_start"() <{level = 10 : i32, message = "bqk,bkd->bqd"}> : () -> ()
    %cst_41 = arith.constant dense<0.000000e+00> : vector<1x8x8xf32>
    %101 = tpu.matmul %100, %87, %cst_41 {dimension_numbers = #tpu.dot_dimension_numbers<[2], [1], [1], [2], [0, 0, 0, 1, 1, 2], [0], [0]>} : vector<1x8x8xbf16>, vector<1x8x8xbf16>, vector<1x8x8xf32> -> vector<1x8x8xf32>
    "tpu.trace_stop"() : () -> ()
    %102 = vector.shape_cast %101 : vector<1x8x8xf32> to vector<8x8xf32>
    %103 = arith.truncf %102 : vector<8x8xf32> to vector<8x8xbf16>
    %104 = vector.extract_strided_slice %30 {offsets = [16, 0], sizes = [8, 32], strides = [1, 1]} : vector<32x32xbf16> to vector<8x32xbf16>
    %cst_42 = arith.constant dense<0.000000e+00> : vector<8x32xf32>
    %105 = tpu.matmul %103, %104, %cst_42 {dimension_numbers = #tpu.dot_dimension_numbers<[1], [0], [0], [1], [0, 0, 1, 1], [], []>} : vector<8x8xbf16>, vector<8x32xbf16>, vector<8x32xf32> -> vector<8x32xf32>
    %106 = arith.addf %81, %105 : vector<8x32xf32>
    %107 = vector.extract_strided_slice %20 {offsets = [0, 24], sizes = [8, 8], strides = [1, 1]} : vector<8x32xbf16> to vector<8x8xbf16>
    %108 = vector.shape_cast %107 : vector<8x8xbf16> to vector<1x8x8xbf16>
    %109 = vector.extract_strided_slice %21 {offsets = [0, 24], sizes = [8, 8], strides = [1, 1]} : vector<8x32xbf16> to vector<8x8xbf16>
    %110 = vector.shape_cast %109 : vector<8x8xbf16> to vector<1x8x8xbf16>
    %111 = vector.extract_strided_slice %22 {offsets = [0, 24], sizes = [8, 8], strides = [1, 1]} : vector<8x32xbf16> to vector<8x8xbf16>
    %112 = vector.shape_cast %111 : vector<8x8xbf16> to vector<1x8x8xbf16>
    "tpu.trace_start"() <{level = 10 : i32, message = "bqd,bkd->bqk"}> : () -> ()
    %cst_43 = arith.constant dense<0.000000e+00> : vector<1x8x8xf32>
    %113 = tpu.matmul %108, %110, %cst_43 {dimension_numbers = #tpu.dot_dimension_numbers<[2], [2], [1], [1], [0, 0, 0, 1, 1, 1], [0], [0]>} : vector<1x8x8xbf16>, vector<1x8x8xbf16>, vector<1x8x8xf32> -> vector<1x8x8xf32>
    "tpu.trace_stop"() : () -> ()
    %114 = arith.addf %113, %29 : vector<1x8x8xf32>
    %cst_44 = arith.constant dense<0xFF800000> : vector<1x8xf32>
    %115 = vector.multi_reduction <maximumf>, %114, %cst_44 [2] : vector<1x8x8xf32> to vector<1x8xf32>
    %116 = vector.shape_cast %115 : vector<1x8xf32> to vector<1x8x1xf32>
    %117 = vector.broadcast %116 : vector<1x8x1xf32> to vector<1x8x8xf32>
    %118 = arith.subf %114, %117 : vector<1x8x8xf32>
    %119 = math.exp %118 : vector<1x8x8xf32>
    %cst_45 = arith.constant dense<0.000000e+00> : vector<1x8xf32>
    %120 = vector.multi_reduction <add>, %119, %cst_45 [2] : vector<1x8x8xf32> to vector<1x8xf32>
    %121 = vector.shape_cast %120 : vector<1x8xf32> to vector<1x8x1xf32>
    %122 = tpu.reciprocal %121 {approx = true} : vector<1x8x1xf32> -> vector<1x8x1xf32>
    %123 = vector.broadcast %122 : vector<1x8x1xf32> to vector<1x8x8xf32>
    %124 = arith.mulf %119, %123 : vector<1x8x8xf32>
    %125 = arith.truncf %124 : vector<1x8x8xf32> to vector<1x8x8xbf16>
    "tpu.trace_start"() <{level = 10 : i32, message = "bqk,bkd->bqd"}> : () -> ()
    %cst_46 = arith.constant dense<0.000000e+00> : vector<1x8x8xf32>
    %126 = tpu.matmul %125, %112, %cst_46 {dimension_numbers = #tpu.dot_dimension_numbers<[2], [1], [1], [2], [0, 0, 0, 1, 1, 2], [0], [0]>} : vector<1x8x8xbf16>, vector<1x8x8xbf16>, vector<1x8x8xf32> -> vector<1x8x8xf32>
    "tpu.trace_stop"() : () -> ()
    %127 = vector.shape_cast %126 : vector<1x8x8xf32> to vector<8x8xf32>
    %128 = arith.truncf %127 : vector<8x8xf32> to vector<8x8xbf16>
    %129 = vector.extract_strided_slice %30 {offsets = [24, 0], sizes = [8, 32], strides = [1, 1]} : vector<32x32xbf16> to vector<8x32xbf16>
    %cst_47 = arith.constant dense<0.000000e+00> : vector<8x32xf32>
    %130 = tpu.matmul %128, %129, %cst_47 {dimension_numbers = #tpu.dot_dimension_numbers<[1], [0], [0], [1], [0, 0, 1, 1], [], []>} : vector<8x8xbf16>, vector<8x32xbf16>, vector<8x32xf32> -> vector<8x32xf32>
    %131 = arith.addf %106, %130 : vector<8x32xf32>
    %c0_48 = arith.constant 0 : index
    %c0_49 = arith.constant 0 : index
    %132 = vector.load %arg12[%c0_48, %c0_49] : memref<1x32xf32, #tpu.memory_space<vmem>>, vector<1x32xf32>
    %133 = vector.broadcast %132 : vector<1x32xf32> to vector<8x32xf32>
    %134 = arith.addf %131, %133 : vector<8x32xf32>
    %c0_50 = arith.constant 0 : index
    %c0_51 = arith.constant 0 : index
    %135 = vector.load %arg13[%c0_50, %c0_51] : memref<8x32xf32, #tpu.memory_space<vmem>>, vector<8x32xf32>
    tpu.vector_store %arg13[%c0_50, %c0_51], %134 {strides = array<i32>} : memref<8x32xf32, #tpu.memory_space<vmem>>, vector<8x32xf32>,
    return
  }
  func.func @transform_0(%arg0: i32) -> (i32, i32) {
    %c0_i32 = arith.constant 0 : i32
    %c0_i32_0 = arith.constant 0 : i32
    return %arg0, %c0_i32 : i32, i32
  }
  func.func @transform_1(%arg0: i32) -> (i32, i32) {
    %c0_i32 = arith.constant 0 : i32
    %c0_i32_0 = arith.constant 0 : i32
    return %arg0, %c0_i32 : i32, i32
  }
  func.func @transform_2(%arg0: i32) -> (i32, i32) {
    %c0_i32 = arith.constant 0 : i32
    %c0_i32_0 = arith.constant 0 : i32
    return %arg0, %c0_i32 : i32, i32
  }
  func.func @transform_3(%arg0: i32) -> (i32, i32, i32) {
    %c0_i32 = arith.constant 0 : i32
    %c0_i32_0 = arith.constant 0 : i32
    %c0_i32_1 = arith.constant 0 : i32
    return %arg0, %c0_i32, %c0_i32_0 : i32, i32, i32
  }
  func.func @transform_4(%arg0: i32) -> (i32, i32) {
    %c0_i32 = arith.constant 0 : i32
    %c0_i32_0 = arith.constant 0 : i32
    %c0_i32_1 = arith.constant 0 : i32
    return %c0_i32, %c0_i32_0 : i32, i32
  }
  func.func @transform_5(%arg0: i32) -> (i32, i32) {
    %c0_i32 = arith.constant 0 : i32
    %c0_i32_0 = arith.constant 0 : i32
    %c0_i32_1 = arith.constant 0 : i32
    return %c0_i32, %c0_i32_0 : i32, i32
  }
  func.func @transform_6(%arg0: i32) -> (i32, i32) {
    %c0_i32 = arith.constant 0 : i32
    %c0_i32_0 = arith.constant 0 : i32
    %c0_i32_1 = arith.constant 0 : i32
    return %c0_i32, %c0_i32_0 : i32, i32
  }
  func.func @transform_7(%arg0: i32) -> (i32, i32) {
    %c0_i32 = arith.constant 0 : i32
    %c0_i32_0 = arith.constant 0 : i32
    %c0_i32_1 = arith.constant 0 : i32
    return %c0_i32, %c0_i32_0 : i32, i32
  }
  func.func @transform_8(%arg0: i32) -> (i32, i32) {
    %c0_i32 = arith.constant 0 : i32
    %c0_i32_0 = arith.constant 0 : i32
    %c0_i32_1 = arith.constant 0 : i32
    return %c0_i32, %c0_i32_0 : i32, i32
  }
  func.func @transform_9(%arg0: i32) -> (i32, i32) {
    %c0_i32 = arith.constant 0 : i32
    %c0_i32_0 = arith.constant 0 : i32
    %c0_i32_1 = arith.constant 0 : i32
    return %c0_i32, %c0_i32_0 : i32, i32
  }
  func.func @transform_10(%arg0: i32) -> (i32, i32) {
    %c0_i32 = arith.constant 0 : i32
    %c0_i32_0 = arith.constant 0 : i32
    %c0_i32_1 = arith.constant 0 : i32
    return %c0_i32, %c0_i32_0 : i32, i32
  }
  func.func @transform_11(%arg0: i32) -> (i32, i32) {
    %c0_i32 = arith.constant 0 : i32
    %c0_i32_0 = arith.constant 0 : i32
    %c0_i32_1 = arith.constant 0 : i32
    return %c0_i32, %c0_i32_0 : i32, i32
  }
  func.func @transform_12(%arg0: i32) -> (i32, i32) {
    %c0_i32 = arith.constant 0 : i32
    %c0_i32_0 = arith.constant 0 : i32
    return %arg0, %c0_i32 : i32, i32
  }
}

</mosaic_0001>

<bundles_post_ra>
// kernel: tpu_custom_call.1
= control target key start
LH: loop header
LB: loop body
LE: loop exit
PB: predicated region body
PF: predicated region fallthrough
CT: control target
= control target key end

     0   :  { %s2795_s0 = inlined_call_operand.hbm [shape: bf16[16,32], index: 0, kind: input, shape index: {}]   ;;  %s2796_s1 = inlined_call_operand.hbm [shape: bf16[16,32], index: 1, kind: input, shape index: {}]   ;;  %s2797_s2 = inlined_call_operand.hbm [shape: bf16[16,32], index: 2, kind: input, shape index: {}]   ;;  %s2798_s3 = inlined_call_operand.hbm [shape: s8[2,8,8], index: 3, kind: input, shape index: {}]   ;;  %s2799_s4 = inlined_call_operand.hbm [shape: bf16[32,32], index: 4, kind: input, shape index: {}]   ;;  %s2800_s5 = inlined_call_operand.vmem [shape: f32[1,32], index: 5, kind: input, shape index: {}]   ;;  %s2801_s6 = inlined_call_operand.hbm [shape: bf16[32,32], index: 6, kind: input, shape index: {}]   ;;  %s2802_s7 = inlined_call_operand.vmem [shape: f32[1,32], index: 7, kind: input, shape index: {}]   ;;  %s2803_s8 = inlined_call_operand.hbm [shape: bf16[32,32], index: 8, kind: input, shape index: {}]   ;;  %s2804_s9 = inlined_call_operand.hbm [shape: f32[1,32], index: 9, kind: input, shape index: {}]   ;;  %s2805_s10 = inlined_call_operand.vmem [shape: bf16[32,32], index: 10, kind: input, shape index: {}]   ;;  %s2806_s11 = inlined_call_operand.vmem [shape: f32[1,32], index: 11, kind: input, shape index: {}]   ;;  %s2807_s12 = inlined_call_operand.hbm [shape: f32[16,32], index: 12, kind: output, shape index: {}]  }
   0x1   :  { %2827 = sst [smem:[#allocation30_spill]] %s2799_s4 }
   0x2   :  { %2828 = sst [smem:[#allocation31_spill]] %s2800_s5 }
   0x3   :  { %2829 = sst [smem:[#allocation32_spill]] %s2801_s6 }
   0x4   :  { %2830 = sst [smem:[#allocation33_spill]] %s2805_s10 }
   0x5   :  { %2831 = sst [smem:[#allocation34_spill]] %s2806_s11 }
   0x6   :  { %2832 = sst [smem:[#allocation35_spill]] %s2807_s12 }
   0x7   :  { %17 = vsyncpa [#allocation3], 0 }
   0x8   :  { %19 = vsyncpa [#allocation3 + $0x1], 0 }
   0x9   :  { %20 = vsyncpa [#allocation6], 0 }
   0xa   :  { %22 = vsyncpa [#allocation6 + $0x1], 0 }
   0xb   :  { %23 = vsyncpa [#allocation9], 0 }
   0xc   :  { %25 = vsyncpa [#allocation9 + $0x1], 0 }
   0xd   :  { %26 = vsyncpa [#allocation12], 0 }
   0xe   :  { %27 = vsyncpa [#allocation15], 0 }
   0xf   :  { %28 = vsyncpa [#allocation4], 0 }
  0x10   :  { %30 = vsyncpa [#allocation4 + $0x1], 0  ;;  %s2331_s21 = smov 0   ;;  %s2333_s22 = smov 0  }
  0x11   :  { %s2335_s23 = smov 0   ;;  %s2337_s24 = smov 0  }
  0x12 LB: > { %2833 = sst [smem:[#allocation24_spill]] %s2236_s21  ;;  %s2352_s25 = sadd.s32 4294967295, %s2248_s24   ;;  %s2248_s24 = sphi %s2337_s24, %s2872_s24   ;;  %s2244_s23 = sphi %s2335_s23, %s2877_s23   ;;  %s2240_s22 = sphi %s2333_s22, %s2876_s22   ;;  %s2236_s21 = sphi %s2331_s21, %s2875_s21  }
  0x13   : > { %2834 = sst [smem:[#allocation25_spill]] %s2244_s23  ;;  %s1634_s26 = sadd.s32 4294967294, %s2248_s24  }
  0x14   : > { %p56_p0 = scmp.ne.s32.totalorder %s2240_s22, %s2236_s21  ;;  %p2818_p1 = scmp.eq.s32.totalorder %s2352_s25, 0 }
  0x15   : > { %p326_p2 = scmp.eq.s32.totalorder %s2352_s25, 1  ;;  %p332_p3 = scmp.eq.s32.totalorder %s1634_s26, 1 }
  0x16   : > { %p2361_p4 = por %p2818_p1, %p56_p0  ;;  %p1635_p5 = scmp.ge.s32.totalorder %s2248_s24, 1 }
  0x17   : > { %p2366_p6 = por %p332_p3, %p56_p0  ;;  %p339_p7 = scmp.lt.s32.totalorder %s2248_s24, 3 }
  0x18   : > { %s2835_s27 = scalar_select %p2361_p4, 1, 0 }
  0x19   : > { %s2836_s28 = scalar_select %p2366_p6, 1, 0 }
  0x1a   : > { %p2371_p8 = pnand %p1635_p5, %p339_p7  ;;  %s2250_s30 = smov [#allocation10]  }
  0x1b   : > { %2837 = sst [smem:[#allocation26_spill]] %s2836_s28  ;;  %s351_s13 = sshll.u32 %s2250_s30, 4  ;;  %s352_s13 = int_to_ptr.vmem [resolvable:$true] %s351_s13 }
  0x1c   : > { %s2838_s29 = scalar_select %p2371_p8, 1, 0 }
  0x1d   : > { %p1843_p9 = pneg %p2371_p8  ;;  %s2251_s15 = smov [#allocation11]  }
  0x1e   : > { %s367_s16 = sshll.u32 %s2251_s15, 4  ;;  %s1959_s17 = scalar_lea.vmem %s352_s13, 256  ;;  %s368_s16 = int_to_ptr.vmem [resolvable:$true] %s367_s16 }
  0x1f   : > { %p2380_p11 = pnand %p1843_p9, %p2818_p1  ;;  %p1960_p13 = scmp.ne.s32.totalorder %s352_s13, %s1959_s17 }
  0x20   : > { %p1967_p5 = scmp.lt.s32.totalorder %s352_s13, %s352_s13  ;;  %p1968_p7 = scmp.lt.s32.totalorder %s1959_s17, %s1959_s17 }
  0x21   : > { %s2839_s14 = scalar_select %p2380_p11, 1, 0 }
  0x22   : > { %p2819_p12 = pneg %p2380_p11  ;;  %p1969_p10 = por %p1968_p7, %p1967_p5 }
  0x24   : > { %p1962_p0 = pnand %p1960_p13, %p2819_p12 }
  0x26   : > { %p1963_p3 = pneg %p1962_p0 }
  0x28   : > { %p1970_p9 = pnand %p1969_p10, %p1963_p3 }
  0x2a   : > { %1973 = shalt.err (!%p1970_p9)
}
  0x2b   : > { %s2808_s18 = smov 64   ;;  %s2809_s19 = smov 4  }
  0x2c   : > { %s2840_s4 = sld [smem:[#allocation30_spill]]  ;;  %s1985_s30 = scalar_lea.vmem %s368_s16, 256 }
  0x2d   : > { %p1986_p13 = scmp.ne.s32.totalorder %s368_s16, %s1985_s30  ;;  %p1993_p10 = scmp.lt.s32.totalorder %s368_s16, %s368_s16 }
  0x2e   : > { %p1994_p3 = scmp.lt.s32.totalorder %s1985_s30, %s1985_s30 }
  0x2f   : > { %p1988_p0 = pnand %p1986_p13, %p2819_p12 }
  0x30   : > { %p1995_p7 = por %p1994_p3, %p1993_p10 }
  0x31   : > { %p1989_p5 = pneg %p1988_p0 }
  0x32   : > { %1846 = dma.hbm_to_vmem [thread:$0]  (!%p2380_p11), %s2840_s4, 256, %s352_s13, [#allocation9], %s2808_s18, %s2808_s18, %s2809_s19  }
  0x33   : > { %p1996_p9 = pnand %p1995_p7, %p1989_p5 }
  0x35   : > { %1999 = shalt.err (!%p1996_p9)
}
  0x36   : > { %s2841_s6 = sld [smem:[#allocation32_spill]]  ;;  %s2409_s13 = sadd.s32 1, %s2248_s24  }
  0x37   : > { %2842 = sst [smem:[#allocation27_spill]] %s2409_s13  ;;  %s43_s20 = sadd.s32 1, %s2244_s23 }
  0x38   : > { %s40_s26 = ssub.s32 %s2248_s24, %s2409_s13  ;;  %p50_p13 = scmp.ne.s32.totalorder %s2244_s23, %s2240_s22 }
  0x39   : > { %p41_p0 = scmp.eq.s32.totalorder %s40_s26, 0  ;;  %p51_p5 = scmp.eq.s32.totalorder %s2248_s24, 0 }
  0x3a   : > { %p2419_p10 = por %p326_p2, %p50_p13  ;;  %p1877_p3 = scmp.lt.s32.totalorder %s2248_s24, 2 }
  0x3b   : > { %s2425_s15 = scalar_select %p41_p0, %s2244_s23, %s43_s20  }
  0x3c   : > { %1849 = dma.hbm_to_vmem [thread:$0]  (!%p2380_p11), %s2841_s6, 256, %s368_s16, [#allocation12], %s2808_s18, %s2808_s18, %s2809_s19  }
  0x3d   : > { %s2843_s30 = scalar_select %p2419_p10, 1, 0 }
  0x3e   : > { %2845 = sst [smem:[#allocation29_spill]] %s2425_s15  ;;  %p52_p7 = por %p51_p5, %p50_p13 }
  0x3f   : > { %2844 = sst [smem:[#allocation28_spill]] %s2843_s30  ;;  %s2428_s17 = sand.u32 1, %s2244_s23  }
  0x40   : > { %s2431_s16 = sshll.u32 %s2428_s17, 2  ;;  %s2434_s18 = sshll.u32 %s2248_s24, 6 }
  0x41   : > { %p2436_p9 = pnand %p1877_p3, %p52_p7  ;;  %s2820_s19 = sand.u32 1, %s2248_s24  }
  0x42   : > { %s2445_s20 = scalar_lea.hbm %s2796_s1, %s2434_s18  ;;  %s436_s15 = scalar_lea.vmem [#allocation5], %s2431_s16 }
  0x43   : > { %s443_s23 = sshll.u32 %s436_s15, 4  ;;  %s2450_s13 = scalar_lea.sflag [#allocation6], %s2820_s19  ;;  %s444_s23 = int_to_ptr.vmem [resolvable:$true] %s443_s23 }
  0x44   : > { %s2000_s28 = scalar_lea.hbm %s2445_s20, 64  ;;  %p2456_p13 = pneg %p2436_p9 }
  0x45   : > { %p2001_p2 = scmp.ne.s32.totalorder %s2445_s20, %s2000_s28  ;;  %s2005_s12 = scalar_lea.hbm %s2796_s1, 128 }
  0x46   : > { %p2006_p3 = scmp.lt.s32.totalorder %s2445_s20, %s2796_s1  ;;  %p2007_p7 = scmp.lt.s32.totalorder %s2005_s12, %s2000_s28 }
  0x47   : > { %p2003_p0 = pnand %p2456_p13, %p2001_p2 }
  0x48   : > { %p2008_p1 = por %p2007_p7, %p2006_p3 }
  0x49   : > { %p2004_p5 = pneg %p2003_p0 }
  0x4b   : > { %p2009_p12 = pnand %p2008_p1, %p2004_p5 }
  0x4d   : > { %2012 = shalt.err (!%p2009_p12)
}
  0x4e   : > { %s2013_s19 = scalar_lea.vmem %s444_s23, 64  ;;  %s2254_s11 = smov [#allocation5]  }
  0x4f   : > { %p2014_p6 = scmp.ne.s32.totalorder %s444_s23, %s2013_s19  ;;  %s2018_s10 = sshll.u32 %s2254_s11, 4  ;;  %s2019_s10 = int_to_ptr.vmem [resolvable:$false] %s2018_s10 }
  0x50   : > { %s2020_s5 = scalar_lea.vmem %s2019_s10, 128  ;;  %p2021_p2 = scmp.lt.s32.totalorder %s444_s23, %s2019_s10 }
  0x51   : > { %p2016_p10 = pnand %p2014_p6, %p2456_p13  ;;  %p2022_p0 = scmp.lt.s32.totalorder %s2020_s5, %s2013_s19 }
  0x53   : > { %p2017_p4 = pneg %p2016_p10  ;;  %p2023_p8 = por %p2022_p0, %p2021_p2 }
  0x55   : > { %p2024_p11 = pnand %p2023_p8, %p2017_p4 }
  0x57   : > { %2027 = shalt.err (!%p2024_p11)
}
  0x58   : > { %1862 = dma.hbm_to_vmem [thread:$0]  (!%p2436_p9), %s2445_s20, 64, %s444_s23, %s2450_s13  }
  0x59   : > { %s2255_s12 = smov [#allocation13]   ;;  %s2256_s30 = smov [#allocation14]  }
  0x5a   : > { %s383_s28 = sshll.u32 %s2255_s12, 4  ;;  %s397_s4 = sshll.u32 %s2256_s30, 4  ;;  %s384_s28 = int_to_ptr.vmem [resolvable:$true] %s383_s28  ;;  %s398_s4 = int_to_ptr.vmem [resolvable:$true] %s397_s4 }
  0x5b   : > { %s2039_s6 = scalar_lea.vmem %s384_s28, 256  ;;  %p2848_p6 = scmp.ne.s32.totalorder %s2839_s14, 0 }
  0x5c   : > { %p2040_p1 = scmp.ne.s32.totalorder %s384_s28, %s2039_s6  ;;  %p2047_p3 = scmp.lt.s32.totalorder %s384_s28, %s384_s28 }
  0x5d   : > { %p2849_p12 = pneg %p2848_p6  ;;  %p2048_p4 = scmp.lt.s32.totalorder %s2039_s6, %s2039_s6 }
  0x5f   : > { %p2042_p10 = pnand %p2040_p1, %p2849_p12  ;;  %p2049_p8 = por %p2048_p4, %p2047_p3 }
  0x61   : > { %p2043_p5 = pneg %p2042_p10 }
  0x63   : > { %p2050_p11 = pnand %p2049_p8, %p2043_p5 }
  0x65   : > { %2053 = shalt.err (!%p2050_p11)
}
  0x66   : > { %s2850_s5 = smov 4   ;;  %s2851_s10 = smov 64  }
  0x67   : > { %1852 = dma.hbm_to_vmem [thread:$0]  (!%p2848_p6), %s2803_s8, 256, %s384_s28, [#allocation12], %s2851_s10, %s2851_s10, %s2850_s5  }
  0x68   : > { %s2065_s19 = scalar_lea.vmem %s398_s4, 16  ;;  %p2852_p2 = pmov %p2849_p12 }
  0x69   : > { %p2066_p7 = scmp.ne.s32.totalorder %s398_s4, %s2065_s19  ;;  %s2072_s20 = scalar_lea.vmem %s398_s4, 32 }
  0x6a   : > { %p2073_p12 = scmp.lt.s32.totalorder %s398_s4, %s398_s4  ;;  %p2074_p10 = scmp.lt.s32.totalorder %s2072_s20, %s2065_s19 }
  0x6b   : > { %p2068_p0 = pnand %p2066_p7, %p2852_p2 }
  0x6c   : > { %p2075_p5 = por %p2074_p10, %p2073_p12 }
  0x6d   : > { %p2069_p1 = pneg %p2068_p0 }
  0x6f   : > { %p2076_p3 = pnand %p2075_p5, %p2069_p1 }
  0x71   : > { %2079 = shalt.err (!%p2076_p3)
}
  0x72   : > { %1855 = dma.hbm_to_vmem [thread:$0]  (!%p2848_p6), %s2804_s9, 16, %s398_s4, [#allocation15]  }
  0x73   : > { %s2498_s6 = scalar_lea.hbm %s2795_s0, %s2434_s18  ;;  %s418_s5 = scalar_lea.vmem [#allocation2], %s2431_s16 }
  0x74   : > { %s425_s10 = sshll.u32 %s418_s5, 4  ;;  %s2505_s23 = scalar_lea.hbm %s2797_s2, %s2434_s18  ;;  %s426_s10 = int_to_ptr.vmem [resolvable:$true] %s425_s10 }
  0x75   : > { %s415_s19 = scalar_lea.sflag [#allocation3], %s2428_s17  ;;  %s2080_s20 = scalar_lea.hbm %s2498_s6, 64 }
  0x76   : > { %p2081_p4 = scmp.ne.s32.totalorder %s2498_s6, %s2080_s20  ;;  %s2085_s12 = scalar_lea.hbm %s2795_s0, 128 }
  0x77   : > { %p2086_p11 = scmp.lt.s32.totalorder %s2498_s6, %s2795_s0  ;;  %p2087_p7 = scmp.lt.s32.totalorder %s2085_s12, %s2080_s20 }
  0x78   : > { %p2083_p6 = pnand %p2081_p4, %p2456_p13 }
  0x79   : > { %p2088_p2 = por %p2087_p7, %p2086_p11 }
  0x7a   : > { %p2084_p8 = pneg %p2083_p6 }
  0x7c   : > { %p2089_p0 = pnand %p2088_p2, %p2084_p8 }
  0x7e   : > { %2092 = shalt.err (!%p2089_p0)
}
  0x7f   : > { %s2093_s18 = scalar_lea.vmem %s426_s10, 64  ;;  %s2257_s5 = smov [#allocation2]  }
  0x80   : > { %p2094_p1 = scmp.ne.s32.totalorder %s426_s10, %s2093_s18  ;;  %s2098_s14 = sshll.u32 %s2257_s5, 4  ;;  %s2099_s14 = int_to_ptr.vmem [resolvable:$false] %s2098_s14 }
  0x81   : > { %s2100_s11 = scalar_lea.vmem %s2099_s14, 128  ;;  %p2101_p5 = scmp.lt.s32.totalorder %s426_s10, %s2099_s14 }
  0x82   : > { %p2096_p12 = pnand %p2094_p1, %p2456_p13  ;;  %p2102_p3 = scmp.lt.s32.totalorder %s2100_s11, %s2093_s18 }
  0x84   : > { %p2097_p10 = pneg %p2096_p12  ;;  %p2103_p4 = por %p2102_p3, %p2101_p5 }
  0x86   : > { %p2104_p6 = pnand %p2103_p4, %p2097_p10 }
  0x88   : > { %2107 = shalt.err (!%p2104_p6)
}
  0x89   : > { %1859 = dma.hbm_to_vmem [thread:$0]  (!%p2436_p9), %s2498_s6, 64, %s426_s10, %s415_s19  }
  0x8a   : > { %s454_s20 = scalar_lea.vmem [#allocation7], %s2431_s16  ;;  %s1647_s15 = sshll.u32 %s2428_s17, 1 }
  0x8b   : > { %s461_s4 = sshll.u32 %s454_s20, 4  ;;  %s2108_s12 = scalar_lea.hbm %s2505_s23, 64  ;;  %s462_s4 = int_to_ptr.vmem [resolvable:$true] %s461_s4 }
  0x8c   : > { %p2109_p8 = scmp.ne.s32.totalorder %s2505_s23, %s2108_s12  ;;  %s2113_s18 = scalar_lea.hbm %s2797_s2, 128 }
  0x8d   : > { %p2114_p2 = scmp.lt.s32.totalorder %s2505_s23, %s2797_s2  ;;  %p2115_p0 = scmp.lt.s32.totalorder %s2113_s18, %s2108_s12 }
  0x8e   : > { %p2111_p11 = pnand %p2109_p8, %p2456_p13 }
  0x8f   : > { %p2116_p1 = por %p2115_p0, %p2114_p2 }
  0x90   : > { %p2112_p7 = pneg %p2111_p11 }
  0x92   : > { %p2117_p12 = pnand %p2116_p1, %p2112_p7 }
  0x94   : > { %2120 = shalt.err (!%p2117_p12)
}
  0x95   : > { %s2121_s16 = scalar_lea.vmem %s462_s4, 64  ;;  %s2258_s17 = smov [#allocation7]  }
  0x96   : > { %p2122_p10 = scmp.ne.s32.totalorder %s462_s4, %s2121_s16  ;;  %s2126_s6 = sshll.u32 %s2258_s17, 4  ;;  %s2127_s6 = int_to_ptr.vmem [resolvable:$false] %s2126_s6 }
  0x97   : > { %s2128_s10 = scalar_lea.vmem %s2127_s6, 128  ;;  %p2129_p4 = scmp.lt.s32.totalorder %s462_s4, %s2127_s6 }
  0x98   : > { %p2124_p5 = pnand %p2122_p10, %p2456_p13  ;;  %p2130_p6 = scmp.lt.s32.totalorder %s2128_s10, %s2121_s16 }
  0x9a   : > { %p2125_p3 = pneg %p2124_p5  ;;  %p2131_p8 = por %p2130_p6, %p2129_p4 }
  0x9c   : > { %p2132_p11 = pnand %p2131_p8, %p2125_p3 }
  0x9e   : > { %2135 = shalt.err (!%p2132_p11)
}
  0x9f   : > { %1865 = dma.hbm_to_vmem [thread:$0]  (!%p2436_p9), %s2505_s23, 64, %s462_s4, %s2450_s13  }
  0xa0   : > { %s1648_s19 = sshll.u32 %s2248_s24, 5  ;;  %s472_s11 = scalar_lea.vmem [#allocation8], %s1647_s15 }
  0xa1   : > { %s479_s20 = sshll.u32 %s472_s11, 4  ;;  %s477_s30 = scalar_lea.hbm %s2798_s3, %s1648_s19  ;;  %s480_s20 = int_to_ptr.vmem [resolvable:$true] %s479_s20 }
  0xa2   : > { %s2853_s18 = sand.u32 1, %s2248_s24   ;;  %s2136_s14 = scalar_lea.hbm %s477_s30, 32 }
  0xa3   : > { %s469_s5 = scalar_lea.sflag [#allocation9], %s2853_s18  ;;  %p2137_p7 = scmp.ne.s32.totalorder %s477_s30, %s2136_s14 }
  0xa4   : > { %s2141_s6 = scalar_lea.hbm %s2798_s3, 64  ;;  %p2142_p1 = scmp.lt.s32.totalorder %s477_s30, %s2798_s3 }
  0xa5   : > { %p2139_p2 = pnand %p2137_p7, %p2456_p13  ;;  %p2143_p12 = scmp.lt.s32.totalorder %s2141_s6, %s2136_s14 }
  0xa7   : > { %p2140_p0 = pneg %p2139_p2  ;;  %p2144_p10 = por %p2143_p12, %p2142_p1 }
  0xa9   : > { %p2145_p5 = pnand %p2144_p10, %p2140_p0 }
  0xab   : > { %2148 = shalt.err (!%p2145_p5)
}
  0xac   : > { %s2149_s4 = scalar_lea.vmem %s480_s20, 32  ;;  %s2259_s15 = smov [#allocation8]  }
  0xad   : > { %p2150_p3 = scmp.ne.s32.totalorder %s480_s20, %s2149_s4  ;;  %s2154_s10 = sshll.u32 %s2259_s15, 4  ;;  %s2155_s10 = int_to_ptr.vmem [resolvable:$false] %s2154_s10 }
  0xae   : > { %s2156_s19 = scalar_lea.vmem %s2155_s10, 64  ;;  %p2157_p8 = scmp.lt.s32.totalorder %s480_s20, %s2155_s10 }
  0xaf   : > { %p2152_p4 = pnand %p2150_p3, %p2456_p13  ;;  %p2158_p11 = scmp.lt.s32.totalorder %s2156_s19, %s2149_s4 }
  0xb1   : > { %p2153_p6 = pneg %p2152_p4  ;;  %p2159_p7 = por %p2158_p11, %p2157_p8 }
  0xb3   : > { %p2160_p2 = pnand %p2159_p7, %p2153_p6 }
  0xb5   : > { %2163 = shalt.err (!%p2160_p2)
}
  0xb6   : > { %1868 = dma.hbm_to_vmem [thread:$0]  (!%p2436_p9), %s477_s30, 32, %s480_s20, %s469_s5  }
  0xb7   : > { %p2854_p0 = scmp.ne.s32.totalorder %s2838_s29, 0 }
  0xb8   : > { %s2564_s21 = sand.u32 (!%p2854_p0), 1, %s2240_s22   ;;  %p2855_p13 = scmp.ne.s32.totalorder (!%p2854_p0), %s2835_s27, 0 }
  0xb9   : > { %488 = sbr.rel (%p2854_p0) target bundleno = 2681 (0xa79), region = 68  ;;  %s2567_s11 = sshll.u32 (!%p2854_p0), %s2564_s21, 2 }
  0xba   : > { %s491_s12 = scalar_lea.sflag (!%p2854_p0), [#allocation3], %s2564_s21  ;;  %s494_s28 = scalar_lea.vmem (!%p2854_p0), [#allocation2], %s2567_s11 }
  0xbe   : > { %2207 = dma.done.wait (%p2855_p13), %s491_s12, 64  }
  0xbf   : > { %2209 = vsyncadd (%p2855_p13), %s491_s12, 4294967232  ;;  %s499_s29 = sand.u32 1, %s2352_s25   ;;  %s503_s20 = scalar_lea.vmem [#allocation5], %s2567_s11 }
  0xc0   : > { %s500_s26 = scalar_lea.sflag [#allocation6], %s499_s29 }
  0xc1   : > { %2211 = dma.done.wait (%p2855_p13), %s500_s26, 128  }
  0xc2   : > { %2213 = vsyncadd (%p2855_p13), %s500_s26, 4294967168  ;;  %s1653_s30 = sshll.u32 %s2564_s21, 1  ;;  %s512_s18 = scalar_lea.vmem [#allocation7], %s2567_s11 }
  0xc3   : > { %s518_s5 = scalar_lea.sflag [#allocation9], %s499_s29  ;;  %s2583_s14 = scalar_lea.vmem [#allocation8], %s1653_s30 }
  0xc4   : > { %2215 = dma.done.wait (%p2855_p13), %s518_s5, 32  }
  0xc5   : > { %2217 = vsyncadd (%p2855_p13), %s518_s5, 4294967264  ;;  %p2856_p9 = scmp.eq.s32.totalorder %s2352_s25, 0 }
  0xc7   : > { %2219 = dma.done.wait (%p2856_p9), [#allocation9], 256   ;;  %p2857_p1 = pmov %p2856_p9 }
  0xc9   : > { %2221 = vsyncadd (%p2857_p1), [#allocation9], 4294967040  ;;  %p2858_p12 = pmov %p2857_p1 }
  0xca   : > { %p2859_p10 = pmov %p2857_p1 }
  0xcb   : > { %2223 = dma.done.wait (%p2858_p12), [#allocation12], 512  }
  0xcc   : > { %2225 = vsyncadd (%p2859_p10), [#allocation12], 4294966784  ;;  %p2860_p5 = pmov %p2857_p1 }
  0xcd   : > { %p2861_p3 = pmov %p2857_p1 }
  0xce   : > { %2227 = dma.done.wait (%p2860_p5), [#allocation15], 16  }
  0xcf   : > { %2229 = vsyncadd (%p2861_p3), [#allocation15], 4294967280  ;;  %v2260_v0 = vmov 0.0   ;;  %vm2261_vm0 = vmmov 0   ;;  %v1926_v1 = vld [vmem:[#allocation11 + $0x8] sm:$0xff]   ;;  %v1927_v2 = vld [vmem:[#allocation10 + $0x8] sm:$0xff]  }
  0xd0   : > { %1729 = vmatprep.subr.bf16.mxu1 %v2260_v0  ;;  %1721 = vmatprep.subr.bf16.mxu0 %v2260_v0  ;;  %v1928_v3 = vld [vmem:[#allocation11] sm:$0xff]   ;;  %v1929_v4 = vld [vmem:[#allocation10] sm:$0xff]   ;;  %vm618_vm1 = vcmask 261120   ;;  %s2862_s13 = sld [smem:[#allocation31_spill]]  ;;  %vm808_vm2 = vcmask 64512   ;;  %s2262_s23 = smov 120  }
  0xd1   : > { %1733 = vmatprep.mubr.msk.bf16.mxu1 %vm2261_vm0, %v2260_v0  ;;  %1725 = vmatprep.mubr.msk.bf16.mxu0 %vm2261_vm0, %v2260_v0  ;;  %v663_v5 = vld [vmem:[%s503_s20] sm:$0xf]  ;;  %v594_v6 = vld [vmem:[%s494_s28] sm:$0xf]  ;;  %v1663_v7 = vld [vmem:[%s2802_s7] ss:$0 sm:$0xff] }
  0xd2   : > { %1730 = vmatpush3.bf16.msra.mxu1 %v1926_v1  ;;  %1722 = vmatpush3.bf16.msra.mxu0 %v1927_v2  ;;  %v1930_v23 = vld [vmem:[#allocation13 + $0x8] sm:$0xff]   ;;  %v1931_v24 = vld [vmem:[#allocation13] sm:$0xff]   ;;  %v730_v25 = vld [vmem:[%s512_s18] sm:$0xf]  ;;  %vm870_vm4 = vcmask 1043456   ;;  %s2263_s4 = smov 112  }
  0xd3   : > { %1731 = vmatprep.subr.bf16.mxu1 %v2260_v0  ;;  %1723 = vmatprep.subr.bf16.mxu0 %v2260_v0  ;;  %v800_v29 = vld [vmem:[%s2583_s14] sm:$0x3]  ;;  %v1667_v53 = vld [vmem:[#allocation14] ss:$0 sm:$0xff]  ;;  %s2863_s19 = sld [smem:[#allocation33_spill]]  ;;  %s2264_s28 = smov 104  }
  0xd4   : > { %v801_v30 = vunpack.c.0.s8 %v800_v29  ;;  %s1658_s18 = sshll.u32 %s2564_s21, 3  ;;  %s2864_s27 = sld [smem:[#allocation34_spill]] }
  0xd5   : > { %s2865_s16 = sld [smem:[#allocation28_spill]]  ;;  %s1685_s17 = sshll.u32 %s2352_s25, 7 }
  0xd6   : > { %1732 = vmatpush3.bf16.msra.mxu1 %v1928_v3  ;;  %1724 = vmatpush3.bf16.msra.mxu0 %v1929_v4  ;;  %v1659_v8 = vld [vmem:[%s2862_s13] ss:$0 sm:$0xff]  ;;  %vm802_vm3 = vcmp.eq.s32.totalorder %v801_v30, 0  ;;  %s592_s6 = scalar_lea.vmem [#allocation16], %s1658_s18  ;;  %s2866_s15 = sld [smem:[#allocation35_spill]] }
  0xd7   : > { %1745 = vmatprep.subr.bf16.mxu1 %v2260_v0  ;;  %1737 = vmatprep.subr.bf16.mxu0 %v2260_v0  ;;  %v2656_v31 = vsel %vm802_vm3, -1e+30, %v2260_v0  ;;  %s1460_s13 = sshll.u32 %s592_s6, 4  ;;  %s1447_s25 = scalar_lea.sflag [#allocation4], %s2564_s21  ;;  %s2753_s13 = int_to_ptr.vmem [resolvable:$true] %s1460_s13 }
  0xd8   : > { %s2164_s11 = scalar_lea.vmem %s2753_s13, 128  ;;  %s2265_s12 = smov [#allocation16]  }
  0xd9   : > { %1734 = vmatmul.mubr.msk.bf16.vlgmr.msra.gmra.mxu1 %vm618_vm1, %v663_v5  ;;  %1726 = vmatmul.mubr.msk.bf16.vlgmr.msra.gmra.mxu0 %vm618_vm1, %v594_v6  ;;  %v805_v3 = vld [vmem:[%s2863_s19 + $0x4] sm:$0xf]  ;;  %p2165_p4 = scmp.ne.s32.totalorder %s2753_s13, %s2164_s11 }
  0xda   : > { %1747 = vmatprep.mubr.msk.bf16.mxu1 %vm2261_vm0, %v2260_v0  ;;  %1741 = vmatprep.mubr.msk.bf16.mxu0 %vm2261_vm0, %v2260_v0  ;;  %v1033_v4 = vsel %vm870_vm4, %v805_v3, 0 }
  0xdb   : > { %1738 = vmatpush3.bf16.msra.mxu0 %v1930_v23  ;;  %p2867_p6 = scmp.ne.s32.totalorder %s2865_s16, 0 }
  0xdc   : > { %1739 = vmatprep.subr.bf16.mxu0 %v2260_v0  ;;  %s2751_s10 = scalar_lea.hbm %s2866_s15, %s1685_s17 }
  0xdd   : > { %p2166_p8 = pnand %p2165_p4, %p2867_p6 }
  0xdf   : > { %1740 = vmatpush3.bf16.msra.mxu0 %v1931_v24  ;;  %p2167_p11 = pneg %p2166_p8 }
  0xe0   : > { %1751 = vmatprep.subr.bf16.mxu0 %v2260_v0 }
  0xe2   : > { %1742 = vmatmul.mubr.msk.bf16.vlgmr.msra.gmra.mxu0 %vm618_vm1, %v730_v25 }
  0xe3   : > { %1753 = vmatprep.mubr.msk.bf16.mxu0 %vm2261_vm0, %v2260_v0 }
 0x199   : > { %v724_v9 = vpop.f32.mrf.mxu1  ;;  %v656_v11 = vpop.f32.mrf.mxu0 }
 0x19a   : > { %v725_v10 = vadd.f32 %v1663_v7, %v724_v9  ;;  %v657_v12 = vadd.f32 %v1659_v8, %v656_v11  ;;  %v804_v9 = vld [vmem:[%s2863_s19] sm:$0xf] }
 0x19b   : > { %v1735_v13 = vpop.f32.mrf.mxu1  ;;  %v1727_v15 = vpop.f32.mrf.mxu0 }
 0x19c   : > { %v2627_v14 = vpack.c.bf16 %v725_v10, %v725_v10  ;;  %v662_v16 = vmul.f32 0.35355338, %v657_v12  ;;  %v1079_v12 = vsel %vm870_vm4, %v804_v9, 0 }
 0x19d   : > { %v727_v17 = vpop.f32.mrf.mxu1  ;;  %v659_v18 = vpop.f32.mrf.mxu0 }
 0x19e   : > { %919 = vrot.lane.b32.xlu0 %v2627_v14, %s2262_s23  ;;  %v813_v19 = vsel %vm808_vm2, %v2627_v14, 0  ;;  %v2633_v20 = vpack.c.bf16 %v662_v16, %v662_v16 }
 0x19f   : > { %v1736_v21 = vpop.f32.mrf.mxu1  ;;  %1746 = vmatpush3.bf16.xpose.msra.mxu1 %v813_v19  ;;  %v1728_v22 = vpop.f32.mrf.mxu0 }
 0x1a0   : > { %1757 = vmatprep.subr.bf16.mxu1 %v2260_v0 }
 0x1a2   : > { %916 = vrot.lane.b32.xlu0 %v2633_v20, %s2262_s23  ;;  %v791_v47 = vpop.f32.mrf.mxu0 }
 0x1a3   : > { %v792_v54 = vadd.f32 %v1667_v53, %v791_v47 }
 0x1a4   : > { %v1743_v48 = vpop.f32.mrf.mxu0 }
 0x1a5   : > { %v2663_v55 = vpack.c.bf16 %v792_v54, %v792_v54 }
 0x1a6   : > { %1748 = vmatmul.mubr.msk.bf16.vlgmr.msra.gmra.mxu1 %vm808_vm2, %v2633_v20  ;;  %v794_v49 = vpop.f32.mrf.mxu0 }
 0x1a7   : > { %1759 = vmatprep.mubr.msk.bf16.mxu1 %vm2261_vm0, %v2260_v0  ;;  %v872_v56 = vsel %vm870_vm4, %v2663_v55, 0 }
 0x1a8   : > { %v1744_v50 = vpop.f32.mrf.mxu0  ;;  %1752 = vmatpush3.bf16.msra.mxu0 %v872_v56 }
 0x1a9   : > { %1763 = vmatprep.subr.bf16.mxu0 %v2260_v0 }
 0x210   : > { %v920_v26 = vpop.permute.xlu0 %919 }
 0x211   : > { %v925_v27 = vsel %vm808_vm2, %v920_v26, 0 }
 0x212   : > { %1758 = vmatpush3.bf16.xpose.msra.mxu1 %v925_v27 }
 0x213   : > { %1769 = vmatprep.subr.bf16.mxu1 %v2260_v0 }
 0x214   : > { %v917_v28 = vpop.permute.xlu0 %916 }
 0x219   : > { %1760 = vmatmul.mubr.msk.bf16.vlgmr.msra.gmra.mxu1 %vm808_vm2, %v917_v28 }
 0x21a   : > { %1771 = vmatprep.mubr.msk.bf16.mxu1 %vm2261_vm0, %v2260_v0  ;;  %1770 = vmatpush3.bf16.msra.mxu1 %v1033_v4 }
 0x21b   : > { %1781 = vmatprep.subr.bf16.mxu1 %v2260_v0 }
 0x266   : > { %v849_v32 = vpop.f32.mrf.mxu1 }
 0x267   : > { %v850_v33 = vadd.f32 %v849_v32, %v2656_v31 }
 0x268   : > { %v1749_v34 = vpop.f32.mrf.mxu1 }
 0x269   : > { %v855_v35 = vsel %vm808_vm2, %v850_v33, -inf }
 0x26a   : > { %856 = vmax.xlane.f32.xlu1 %v855_v35  ;;  %v852_v36 = vpop.f32.mrf.mxu1 }
 0x26c   : > { %v1750_v37 = vpop.f32.mrf.mxu1 }
 0x2d9   : > { %v961_v38 = vpop.f32.mrf.mxu1 }
 0x2da   : > { %v962_v39 = vadd.f32 %v961_v38, %v2656_v31 }
 0x2db   : > { %v1761_v40 = vpop.f32.mrf.mxu1 }
 0x2dc   : > { %v967_v41 = vsel %vm808_vm2, %v962_v39, -inf }
 0x2dd   : > { %968 = vmax.xlane.f32.xlu1 %v967_v41  ;;  %v964_v42 = vpop.f32.mrf.mxu1 }
 0x2df   : > { %v1762_v43 = vpop.f32.mrf.mxu1 }
 0x2f3   : > { %v857_v44 = vpop.xlane.xlu1 %856 }
 0x2f4   : > { %v858_v45 = vsub.f32 %v850_v33, %v857_v44 }
 0x2f6   : > { %v859_v46 = vmul.f32 1.442695, %v858_v45 }
 0x2f8   : > { %1932 = vpow2.f32 %v859_v46 }
 0x305   : > { %v1933_v51 = vpop.eup %1932 }
 0x306   : > { %v861_v52 = vsel %vm808_vm2, %v1933_v51, 0.0 }
 0x307   : > { %862 = vadd.xlane.f32.xlu0 %v861_v52 }
 0x31d   : > { %1183 = vrot.lane.b32.xlu0 %v2663_v55, %s2263_s4 }
 0x366   : > { %v969_v57 = vpop.xlane.xlu1 %968 }
 0x367   : > { %v970_v58 = vsub.f32 %v962_v39, %v969_v57 }
 0x369   : > { %v971_v59 = vmul.f32 1.442695, %v970_v58 }
 0x36b   : > { %1934 = vpow2.f32 %v971_v59 }
 0x378   : > { %v1935_v60 = vpop.eup %1934 }
 0x379   : > { %v973_v61 = vsel %vm808_vm2, %v1935_v60, 0.0 }
 0x37a   : > { %974 = vadd.xlane.f32.xlu1 %v973_v61 }
 0x38b   : > { %980 = vrot.lane.b32.xlu1 %v2663_v55, %s2262_s23 }
 0x38f   : > { %1123 = vrot.lane.b32.xlu1 %v2627_v14, %s2263_s4 }
 0x390   : > { %v863_v62 = vpop.xlane.xlu0 %862 }
 0x391   : > { %1936 = vrcp.f32 %v863_v62 }
 0x393   : > { %1121 = vrot.lane.b32.xlu1 %v2633_v20, %s2263_s4 }
 0x394   : > { %v1184_v13 = vpop.permute.xlu0 %1183 }
 0x395   : > { %v1189_v18 = vsel %vm870_vm4, %v1184_v13, 0  ;;  %v807_v13 = vld [vmem:[%s2863_s19 + $0xc] sm:$0xf] }
 0x39e   : > { %v1937_v63 = vpop.eup %1936 }
 0x39f   : > { %v865_v1 = vmul.f32 %v1937_v63, %v1933_v51 }
 0x3a1   : > { %v866_v2 = vpack.c.bf16 %v865_v1, %v865_v1 }
 0x3a3   : > { %1754 = vmatmul.mubr.msk.bf16.vlgmr.msra.gmra.mxu0 %vm808_vm2, %v866_v2 }
 0x3a4   : > { %1765 = vmatprep.mubr.msk.bf16.mxu0 %vm2261_vm0, %v2260_v0 }
 0x403   : > { %v975_v5 = vpop.xlane.xlu1 %974 }
 0x404   : > { %1938 = vrcp.f32 %v975_v5 }
 0x407   : > { %v981_v6 = vpop.permute.xlu1 %980 }
 0x408   : > { %v986_v7 = vsel %vm870_vm4, %v981_v6, 0 }
 0x409   : > { %1764 = vmatpush3.bf16.msra.mxu0 %v986_v7 }
 0x40a   : > { %1775 = vmatprep.subr.bf16.mxu0 %v2260_v0 }
 0x40b   : > { %v1124_v22 = vpop.permute.xlu1 %1123 }
 0x40c   : > { %v1129_v26 = vsel %vm808_vm2, %v1124_v22, 0 }
 0x40f   : > { %v1122_v29 = vpop.permute.xlu1 %1121 }
 0x411   : > { %v1939_v8 = vpop.eup %1938 }
 0x412   : > { %v977_v10 = vmul.f32 %v1939_v8, %v1935_v60 }
 0x414   : > { %v978_v11 = vpack.c.bf16 %v977_v10, %v977_v10 }
 0x416   : > { %1766 = vmatmul.mubr.msk.bf16.vlgmr.msra.gmra.mxu0 %vm808_vm2, %v978_v11 }
 0x417   : > { %1776 = vmatpush3.bf16.msra.mxu0 %v1079_v12  ;;  %1777 = vmatprep.mubr.msk.bf16.mxu0 %vm2261_vm0, %v2260_v0 }
 0x418   : > { %1787 = vmatprep.subr.bf16.mxu0 %v2260_v0 }
 0x463   : > { %v908_v15 = vpop.f32.mrf.mxu0 }
 0x464   : > { %v914_v16 = vpack.c.bf16 %v908_v15, %v908_v15  ;;  %v1394_v15 = vsel %vm870_vm4, %v807_v13, 0 }
 0x465   : > { %v1755_v17 = vpop.f32.mrf.mxu0 }
 0x466   : > { %1778 = vmatmul.mubr.msk.bf16.vlgmr.msra.gmra.mxu0 %vm808_vm2, %v914_v16 }
 0x467   : > { %1788 = vmatpush3.bf16.msra.mxu0 %v1189_v18  ;;  %v911_v19 = vpop.f32.mrf.mxu0  ;;  %1789 = vmatprep.mubr.msk.bf16.mxu0 %vm2261_vm0, %v2260_v0 }
 0x468   : > { %1799 = vmatprep.subr.bf16.mxu0 %v2260_v0 }
 0x469   : > { %v1756_v21 = vpop.f32.mrf.mxu0 }
 0x4d6   : > { %v1022_v23 = vpop.f32.mrf.mxu0 }
 0x4d7   : > { %v1028_v24 = vpack.c.bf16 %v1022_v23, %v1022_v23 }
 0x4d8   : > { %v1767_v25 = vpop.f32.mrf.mxu0 }
 0x4d9   : > { %1772 = vmatmul.mubr.msk.bf16.vlgmr.msra.gmra.mxu1 %vm808_vm2, %v1028_v24 }
 0x4da   : > { %1782 = vmatpush3.bf16.xpose.msra.mxu1 %v1129_v26  ;;  %v1025_v27 = vpop.f32.mrf.mxu0  ;;  %1783 = vmatprep.mubr.msk.bf16.mxu1 %vm2261_vm0, %v2260_v0 }
 0x4db   : > { %1793 = vmatprep.subr.bf16.mxu1 %v2260_v0 }
 0x4dc   : > { %v1768_v28 = vpop.f32.mrf.mxu0 }
 0x4e1   : > { %1784 = vmatmul.mubr.msk.bf16.vlgmr.msra.gmra.mxu1 %vm808_vm2, %v1122_v29 }
 0x4e2   : > { %1795 = vmatprep.mubr.msk.bf16.mxu1 %vm2261_vm0, %v2260_v0 }
 0x526   : > { %v2705_v30 = vpop.f32.mrf.mxu0 }
 0x528   : > { %v1779_v32 = vpop.f32.mrf.mxu0 }
 0x52a   : > { %v1118_v33 = vpop.f32.mrf.mxu0 }
 0x52c   : > { %v1780_v34 = vpop.f32.mrf.mxu0 }
 0x599   : > { %v1069_v35 = vpop.f32.mrf.mxu1 }
 0x59b   : > { %v1773_v36 = vpop.f32.mrf.mxu1 }
 0x59d   : > { %v1072_v37 = vpop.f32.mrf.mxu1 }
 0x59f   : > { %v1774_v38 = vpop.f32.mrf.mxu1 }
 0x5a1   : > { %v1165_v39 = vpop.f32.mrf.mxu1 }
 0x5a2   : > { %v1166_v40 = vadd.f32 %v1165_v39, %v2656_v31 }
 0x5a3   : > { %v1785_v41 = vpop.f32.mrf.mxu1 }
 0x5a4   : > { %v1171_v42 = vsel %vm808_vm2, %v1166_v40, -inf }
 0x5a5   : > { %1172 = vmax.xlane.f32.xlu1 %v1171_v42  ;;  %v1168_v43 = vpop.f32.mrf.mxu1 }
 0x5a7   : > { %v1786_v44 = vpop.f32.mrf.mxu1 }
 0x62e   : > { %v1173_v45 = vpop.xlane.xlu1 %1172 }
 0x62f   : > { %v1174_v46 = vsub.f32 %v1166_v40, %v1173_v45 }
 0x631   : > { %v1175_v47 = vmul.f32 1.442695, %v1174_v46 }
 0x633   : > { %1940 = vpow2.f32 %v1175_v47 }
 0x640   : > { %v1941_v48 = vpop.eup %1940 }
 0x641   : > { %v1177_v49 = vsel %vm808_vm2, %v1941_v48, 0.0 }
 0x642   : > { %1178 = vadd.xlane.f32.xlu0 %v1177_v49 }
 0x658   : > { %1281 = vrot.lane.b32.xlu0 %v2627_v14, %s2264_s28 }
 0x65c   : > { %1279 = vrot.lane.b32.xlu0 %v2633_v20, %s2264_s28  ;;  %v806_v20 = vld [vmem:[%s2863_s19 + $0x8] sm:$0xf] }
 0x65d   : > { %v1236_v57 = vsel %vm870_vm4, %v806_v20, 0 }
 0x65e   : > { %1794 = vmatpush3.bf16.msra.mxu1 %v1236_v57 }
 0x65f   : > { %1805 = vmatprep.subr.bf16.mxu1 %v2260_v0 }
 0x6cb   : > { %v1179_v50 = vpop.xlane.xlu0 %1178 }
 0x6cc   : > { %1942 = vrcp.f32 %v1179_v50 }
 0x6cf   : > { %v1282_v53 = vpop.permute.xlu0 %1281 }
 0x6d0   : > { %v1287_v56 = vsel %vm808_vm2, %v1282_v53, 0 }
 0x6d3   : > { %v1280_v14 = vpop.permute.xlu0 %1279 }
 0x6d9   : > { %v1943_v51 = vpop.eup %1942 }
 0x6da   : > { %v1181_v52 = vmul.f32 %v1943_v51, %v1941_v48 }
 0x6dc   : > { %v1182_v54 = vpack.c.bf16 %v1181_v52, %v1181_v52 }
 0x6de   : > { %1790 = vmatmul.mubr.msk.bf16.vlgmr.msra.gmra.mxu0 %vm808_vm2, %v1182_v54 }
 0x6df   : > { %1800 = vmatpush3.bf16.xpose.msra.mxu0 %v1287_v56  ;;  %1801 = vmatprep.mubr.msk.bf16.mxu0 %vm2261_vm0, %v2260_v0 }
 0x6e0   : > { %1811 = vmatprep.subr.bf16.mxu0 %v2260_v0 }
 0x6e6   : > { %1802 = vmatmul.mubr.msk.bf16.vlgmr.msra.gmra.mxu0 %vm808_vm2, %v1280_v14 }
 0x6e7   : > { %1813 = vmatprep.mubr.msk.bf16.mxu0 %vm2261_vm0, %v2260_v0  ;;  %1812 = vmatpush3.bf16.msra.mxu0 %v1394_v15 }
 0x79e   : > { %v1225_v58 = vpop.f32.mrf.mxu0 }
 0x79f   : > { %v1231_v59 = vpack.c.bf16 %v1225_v58, %v1225_v58 }
 0x7a0   : > { %v1791_v60 = vpop.f32.mrf.mxu0 }
 0x7a1   : > { %1796 = vmatmul.mubr.msk.bf16.vlgmr.msra.gmra.mxu1 %vm808_vm2, %v1231_v59 }
 0x7a2   : > { %v1228_v61 = vpop.f32.mrf.mxu0  ;;  %1807 = vmatprep.mubr.msk.bf16.mxu1 %vm2261_vm0, %v2260_v0  ;;  %v1116_v0 = vadd.f32 %v2705_v30, %v1069_v35  ;;  %v1683_v30 = vld [vmem:[%s2864_s27] ss:$0 sm:$0xff] }
 0x7a4   : > { %v1792_v62 = vpop.f32.mrf.mxu0 }
 0x7a6   : > { %v1323_v63 = vpop.f32.mrf.mxu0 }
 0x7a7   : > { %v1324_v1 = vadd.f32 %v1323_v63, %v2656_v31 }
 0x7a8   : > { %v1803_v2 = vpop.f32.mrf.mxu0 }
 0x7a9   : > { %v1329_v3 = vsel %vm808_vm2, %v1324_v1, -inf }
 0x7aa   : > { %1330 = vmax.xlane.f32.xlu0 %v1329_v3  ;;  %v1326_v4 = vpop.f32.mrf.mxu0 }
 0x7ac   : > { %v1804_v5 = vpop.f32.mrf.mxu0 }
 0x833   : > { %v1331_v6 = vpop.xlane.xlu0 %1330 }
 0x834   : > { %v1332_v7 = vsub.f32 %v1324_v1, %v1331_v6 }
 0x836   : > { %v1333_v8 = vmul.f32 1.442695, %v1332_v7 }
 0x838   : > { %1944 = vpow2.f32 %v1333_v8 }
 0x845   : > { %v1945_v9 = vpop.eup %1944 }
 0x846   : > { %v1335_v10 = vsel %vm808_vm2, %v1945_v9, 0.0 }
 0x847   : > { %1336 = vadd.xlane.f32.xlu1 %v1335_v10 }
 0x858   : > { %1341 = vrot.lane.b32.xlu1 %v2663_v55, %s2264_s28  ;;  %s2168_s28 = sshll.u32 %s2265_s12, 4  ;;  %s2169_s28 = int_to_ptr.vmem [resolvable:$false] %s2168_s28 }
 0x859   : > { %s2170_s29 = scalar_lea.vmem %s2169_s28, 256  ;;  %p2171_p7 = scmp.lt.s32.totalorder %s2753_s13, %s2169_s28 }
 0x85a   : > { %p2172_p2 = scmp.lt.s32.totalorder %s2170_s29, %s2164_s11 }
 0x85c   : > { %p2173_p0 = por %p2172_p2, %p2171_p7 }
 0x85e   : > { %p2174_p13 = pnand %p2173_p0, %p2167_p11 }
 0x861   : > { %v1272_v31 = vpop.f32.mrf.mxu1 }
 0x862   : > { %v1278_v11 = vadd.f32 %v1272_v31, %v1116_v0 }
 0x863   : > { %v1797_v12 = vpop.f32.mrf.mxu1 }
 0x865   : > { %v1275_v16 = vpop.f32.mrf.mxu1 }
 0x867   : > { %v1798_v17 = vpop.f32.mrf.mxu1 }
 0x8d0   : > { %v1337_v18 = vpop.xlane.xlu1 %1336 }
 0x8d1   : > { %1946 = vrcp.f32 %v1337_v18 }
 0x8d4   : > { %v1342_v19 = vpop.permute.xlu1 %1341 }
 0x8d5   : > { %v1347_v55 = vsel %vm870_vm4, %v1342_v19, 0 }
 0x8d6   : > { %1806 = vmatpush3.bf16.msra.mxu1 %v1347_v55 }
 0x8de   : > { %v1947_v21 = vpop.eup %1946 }
 0x8df   : > { %v1339_v22 = vmul.f32 %v1947_v21, %v1945_v9 }
 0x8e1   : > { %v1340_v23 = vpack.c.bf16 %v1339_v22, %v1339_v22 }
 0x8e3   : > { %1808 = vmatmul.mubr.msk.bf16.vlgmr.msra.gmra.mxu1 %vm808_vm2, %v1340_v23 }
 0x9a3   : > { %v1383_v24 = vpop.f32.mrf.mxu1 }
 0x9a4   : > { %v1389_v25 = vpack.c.bf16 %v1383_v24, %v1383_v24 }
 0x9a5   : > { %v1809_v26 = vpop.f32.mrf.mxu1 }
 0x9a6   : > { %1814 = vmatmul.mubr.msk.bf16.vlgmr.msra.gmra.mxu0 %vm808_vm2, %v1389_v25 }
 0x9a7   : > { %v1386_v27 = vpop.f32.mrf.mxu1 }
 0x9a9   : > { %v1810_v28 = vpop.f32.mrf.mxu1 }
 0xa66   : > { %v1430_v29 = vpop.f32.mrf.mxu0 }
 0xa67   : > { %v1436_v32 = vadd.f32 %v1430_v29, %v1278_v11 }
 0xa68   : > { %v1815_v33 = vpop.f32.mrf.mxu0 }
 0xa69   : > { %v1444_v34 = vadd.f32 %v1683_v30, %v1436_v32 }
 0xa6a   : > { %v1433_v35 = vpop.f32.mrf.mxu0 }
 0xa6b   : > { %1445 = vst.msk [vmem:[%s592_s6] sm:$0xff] %vm618_vm1, %v1444_v34 }
 0xa6c   : > { %v1816_v36 = vpop.f32.mrf.mxu0 }
 0xa6d   : > { %2177 = shalt.err (!%p2174_p13)
}
 0xa6e   : > { %s2178_s26 = scalar_lea.hbm %s2751_s10, 128  ;;  %s2182_s30 = scalar_lea.hbm %s2866_s15, 256 }
 0xa6f   : > { %p2179_p9 = scmp.ne.s32.totalorder %s2751_s10, %s2178_s26  ;;  %p2183_p10 = scmp.lt.s32.totalorder %s2751_s10, %s2866_s15 }
 0xa70   : > { %p2184_p5 = scmp.lt.s32.totalorder %s2182_s30, %s2178_s26 }
 0xa71   : > { %p2180_p1 = pnand %p2179_p9, %p2867_p6 }
 0xa72   : > { %p2185_p3 = por %p2184_p5, %p2183_p10 }
 0xa73   : > { %p2181_p12 = pneg %p2180_p1 }
 0xa75   : > { %p2186_p4 = pnand %p2185_p3, %p2181_p12 }
 0xa77   : > { %2189 = shalt.err (!%p2186_p4)
}
 0xa78   : > { %1841 = dma.vmem_to_hbm [thread:$0]  (%p2867_p6), %s2753_s13, 128, %s2751_s10, %s1447_s25  }
 0xa79 PF: > { %s2868_s14 = sld [smem:[#allocation24_spill]]  ;;  %p2871_p11 = scmp.ge.s32.totalorder %s2248_s24, 2 }
 0xa7a   : > { %s2869_s27 = sld [smem:[#allocation26_spill]] }
 0xa7f   : > { %s1472_s17 = sand.u32 1, %s2868_s14  }
 0xa80   : > { %p2870_p8 = scmp.ne.s32.totalorder %s2869_s27, 0  ;;  %s1473_s6 = scalar_lea.sflag [#allocation4], %s1472_s17 }
 0xa82   : > { %p1870_p7 = pnand %p2871_p11, %p2870_p8 }
 0xa84   : > { %p1871_p2 = pneg %p1870_p7 }
 0xa86   : > { %2231 = dma.done.wait (%p1871_p2), %s1473_s6, 128  }
 0xa87   : > { %2233 = vsyncadd (%p1871_p2), %s1473_s6, 4294967168  ;;  %s2872_s24 = sld [smem:[#allocation27_spill]]  ;;  %s2875_s21 = smov %s2240_s22 }
 0xa88   : > { %s2873_s23 = sld [smem:[#allocation25_spill]] }
 0xa89   : > { %s2874_s4 = sld [smem:[#allocation29_spill]] }
 0xa8d   : > { %p33_p0 = scmp.ge.s32.totalorder %s2872_s24, 4  }
 0xa8e   : > { %s2876_s22 = smov %s2873_s23 }
 0xa8f   : > { %s2877_s23 = smov %s2874_s4  ;;  %35 = sbr.rel (!%p33_p0) target bundleno = 18 (0x12), region = 166 }
 0xa94   :  { %1478 = vsyncpa [#allocation3], 1 }
 0xa95   :  { %1480 = vsyncpa [#allocation3 + $0x1], 1 }
 0xa96   :  { %1481 = vsyncpa [#allocation6], 1 }
 0xa97   :  { %1483 = vsyncpa [#allocation6 + $0x1], 1 }
 0xa98   :  { %1484 = vsyncpa [#allocation9], 1 }
 0xa99   :  { %1486 = vsyncpa [#allocation9 + $0x1], 1 }
 0xa9a   :  { %1487 = vsyncpa [#allocation12], 1 }
 0xa9b   :  { %1488 = vsyncpa [#allocation15], 1 }
 0xa9c   :  { %1489 = vsyncpa [#allocation4], 1 }
 0xa9d   :  { %1491 = vsyncpa [#allocation4 + $0x1], 1 }

// kernel: tpu_custom_call.1
= control target key start
LH: loop header
LB: loop body
LE: loop exit
PB: predicated region body
PF: predicated region fallthrough
CT: control target
= control target key end

     0   :  { %s2795_s0 = inlined_call_operand.hbm [shape: bf16[16,32], index: 0, kind: input, shape index: {}]   ;;  %s2796_s1 = inlined_call_operand.hbm [shape: bf16[16,32], index: 1, kind: input, shape index: {}]   ;;  %s2797_s2 = inlined_call_operand.hbm [shape: bf16[16,32], index: 2, kind: input, shape index: {}]   ;;  %s2798_s3 = inlined_call_operand.hbm [shape: s8[2,8,8], index: 3, kind: input, shape index: {}]   ;;  %s2799_s4 = inlined_call_operand.hbm [shape: bf16[32,32], index: 4, kind: input, shape index: {}]   ;;  %s2800_s5 = inlined_call_operand.vmem [shape: f32[1,32], index: 5, kind: input, shape index: {}]   ;;  %s2801_s6 = inlined_call_operand.hbm [shape: bf16[32,32], index: 6, kind: input, shape index: {}]   ;;  %s2802_s7 = inlined_call_operand.vmem [shape: f32[1,32], index: 7, kind: input, shape index: {}]   ;;  %s2803_s8 = inlined_call_operand.hbm [shape: bf16[32,32], index: 8, kind: input, shape index: {}]   ;;  %s2804_s9 = inlined_call_operand.hbm [shape: f32[1,32], index: 9, kind: input, shape index: {}]   ;;  %s2805_s10 = inlined_call_operand.vmem [shape: bf16[32,32], index: 10, kind: input, shape index: {}]   ;;  %s2806_s11 = inlined_call_operand.vmem [shape: f32[1,32], index: 11, kind: input, shape index: {}]   ;;  %s2807_s12 = inlined_call_operand.hbm [shape: f32[16,32], index: 12, kind: output, shape index: {}]  }
   0x1   :  { %2827 = sst [smem:[#allocation30_spill]] %s2799_s4 }
   0x2   :  { %2828 = sst [smem:[#allocation31_spill]] %s2800_s5 }
   0x3   :  { %2829 = sst [smem:[#allocation32_spill]] %s2801_s6 }
   0x4   :  { %2830 = sst [smem:[#allocation33_spill]] %s2805_s10 }
   0x5   :  { %2831 = sst [smem:[#allocation34_spill]] %s2806_s11 }
   0x6   :  { %2832 = sst [smem:[#allocation35_spill]] %s2807_s12 }
   0x7   :  { %17 = vsyncpa [#allocation3], 0 }
   0x8   :  { %19 = vsyncpa [#allocation3 + $0x1], 0 }
   0x9   :  { %20 = vsyncpa [#allocation6], 0 }
   0xa   :  { %22 = vsyncpa [#allocation6 + $0x1], 0 }
   0xb   :  { %23 = vsyncpa [#allocation9], 0 }
   0xc   :  { %25 = vsyncpa [#allocation9 + $0x1], 0 }
   0xd   :  { %26 = vsyncpa [#allocation12], 0 }
   0xe   :  { %27 = vsyncpa [#allocation15], 0 }
   0xf   :  { %28 = vsyncpa [#allocation4], 0 }
  0x10   :  { %30 = vsyncpa [#allocation4 + $0x1], 0  ;;  %s2331_s21 = smov 0   ;;  %s2333_s22 = smov 0  }
  0x11   :  { %s2335_s23 = smov 0   ;;  %s2337_s24 = smov 0  }
  0x12 LB: > { %2833 = sst [smem:[#allocation24_spill]] %s2236_s21  ;;  %s2352_s25 = sadd.s32 4294967295, %s2248_s24   ;;  %s2248_s24 = sphi %s2337_s24, %s2872_s24   ;;  %s2244_s23 = sphi %s2335_s23, %s2877_s23   ;;  %s2240_s22 = sphi %s2333_s22, %s2876_s22   ;;  %s2236_s21 = sphi %s2331_s21, %s2875_s21  }
  0x13   : > { %2834 = sst [smem:[#allocation25_spill]] %s2244_s23  ;;  %s1634_s26 = sadd.s32 4294967294, %s2248_s24  }
  0x14   : > { %p56_p0 = scmp.ne.s32.totalorder %s2240_s22, %s2236_s21  ;;  %p2818_p1 = scmp.eq.s32.totalorder %s2352_s25, 0 }
  0x15   : > { %p326_p2 = scmp.eq.s32.totalorder %s2352_s25, 1  ;;  %p332_p3 = scmp.eq.s32.totalorder %s1634_s26, 1 }
  0x16   : > { %p2361_p4 = por %p2818_p1, %p56_p0  ;;  %p1635_p5 = scmp.ge.s32.totalorder %s2248_s24, 1 }
  0x17   : > { %p2366_p6 = por %p332_p3, %p56_p0  ;;  %p339_p7 = scmp.lt.s32.totalorder %s2248_s24, 3 }
  0x18   : > { %s2835_s27 = scalar_select %p2361_p4, 1, 0 }
  0x19   : > { %s2836_s28 = scalar_select %p2366_p6, 1, 0 }
  0x1a   : > { %p2371_p8 = pnand %p1635_p5, %p339_p7  ;;  %s2250_s30 = smov [#allocation10]  }
  0x1b   : > { %2837 = sst [smem:[#allocation26_spill]] %s2836_s28  ;;  %s351_s13 = sshll.u32 %s2250_s30, 4  ;;  %s352_s13 = int_to_ptr.vmem [resolvable:$true] %s351_s13 }
  0x1c   : > { %s2838_s29 = scalar_select %p2371_p8, 1, 0 }
  0x1d   : > { %p1843_p9 = pneg %p2371_p8  ;;  %s2251_s15 = smov [#allocation11]  }
  0x1e   : > { %s367_s16 = sshll.u32 %s2251_s15, 4  ;;  %s1959_s17 = scalar_lea.vmem %s352_s13, 256  ;;  %s368_s16 = int_to_ptr.vmem [resolvable:$true] %s367_s16 }
  0x1f   : > { %p2380_p11 = pnand %p1843_p9, %p2818_p1  ;;  %p1960_p13 = scmp.ne.s32.totalorder %s352_s13, %s1959_s17 }
  0x20   : > { %p1967_p5 = scmp.lt.s32.totalorder %s352_s13, %s352_s13  ;;  %p1968_p7 = scmp.lt.s32.totalorder %s1959_s17, %s1959_s17 }
  0x21   : > { %s2839_s14 = scalar_select %p2380_p11, 1, 0 }
  0x22   : > { %p2819_p12 = pneg %p2380_p11  ;;  %p1969_p10 = por %p1968_p7, %p1967_p5 }
  0x24   : > { %p1962_p0 = pnand %p1960_p13, %p2819_p12 }
  0x26   : > { %p1963_p3 = pneg %p1962_p0 }
  0x28   : > { %p1970_p9 = pnand %p1969_p10, %p1963_p3 }
  0x2a   : > { %1973 = shalt.err (!%p1970_p9)
}
  0x2b   : > { %s2808_s18 = smov 64   ;;  %s2809_s19 = smov 4  }
  0x2c   : > { %s2840_s4 = sld [smem:[#allocation30_spill]]  ;;  %s1985_s30 = scalar_lea.vmem %s368_s16, 256 }
  0x2d   : > { %p1986_p13 = scmp.ne.s32.totalorder %s368_s16, %s1985_s30  ;;  %p1993_p10 = scmp.lt.s32.totalorder %s368_s16, %s368_s16 }
  0x2e   : > { %p1994_p3 = scmp.lt.s32.totalorder %s1985_s30, %s1985_s30 }
  0x2f   : > { %p1988_p0 = pnand %p1986_p13, %p2819_p12 }
  0x30   : > { %p1995_p7 = por %p1994_p3, %p1993_p10 }
  0x31   : > { %p1989_p5 = pneg %p1988_p0 }
  0x32   : > { %1846 = dma.hbm_to_vmem [thread:$0]  (!%p2380_p11), %s2840_s4, 256, %s352_s13, [#allocation9], %s2808_s18, %s2808_s18, %s2809_s19  }
  0x33   : > { %p1996_p9 = pnand %p1995_p7, %p1989_p5 }
  0x35   : > { %1999 = shalt.err (!%p1996_p9)
}
  0x36   : > { %s2841_s6 = sld [smem:[#allocation32_spill]]  ;;  %s2409_s13 = sadd.s32 1, %s2248_s24  }
  0x37   : > { %2842 = sst [smem:[#allocation27_spill]] %s2409_s13  ;;  %s43_s20 = sadd.s32 1, %s2244_s23 }
  0x38   : > { %s40_s26 = ssub.s32 %s2248_s24, %s2409_s13  ;;  %p50_p13 = scmp.ne.s32.totalorder %s2244_s23, %s2240_s22 }
  0x39   : > { %p41_p0 = scmp.eq.s32.totalorder %s40_s26, 0  ;;  %p51_p5 = scmp.eq.s32.totalorder %s2248_s24, 0 }
  0x3a   : > { %p2419_p10 = por %p326_p2, %p50_p13  ;;  %p1877_p3 = scmp.lt.s32.totalorder %s2248_s24, 2 }
  0x3b   : > { %s2425_s15 = scalar_select %p41_p0, %s2244_s23, %s43_s20  }
  0x3c   : > { %1849 = dma.hbm_to_vmem [thread:$0]  (!%p2380_p11), %s2841_s6, 256, %s368_s16, [#allocation12], %s2808_s18, %s2808_s18, %s2809_s19  }
  0x3d   : > { %s2843_s30 = scalar_select %p2419_p10, 1, 0 }
  0x3e   : > { %2845 = sst [smem:[#allocation29_spill]] %s2425_s15  ;;  %p52_p7 = por %p51_p5, %p50_p13 }
  0x3f   : > { %2844 = sst [smem:[#allocation28_spill]] %s2843_s30  ;;  %s2428_s17 = sand.u32 1, %s2244_s23  }
  0x40   : > { %s2431_s16 = sshll.u32 %s2428_s17, 2  ;;  %s2434_s18 = sshll.u32 %s2248_s24, 6 }
  0x41   : > { %p2436_p9 = pnand %p1877_p3, %p52_p7  ;;  %s2820_s19 = sand.u32 1, %s2248_s24  }
  0x42   : > { %s2445_s20 = scalar_lea.hbm %s2796_s1, %s2434_s18  ;;  %s436_s15 = scalar_lea.vmem [#allocation5], %s2431_s16 }
  0x43   : > { %s443_s23 = sshll.u32 %s436_s15, 4  ;;  %s2450_s13 = scalar_lea.sflag [#allocation6], %s2820_s19  ;;  %s444_s23 = int_to_ptr.vmem [resolvable:$true] %s443_s23 }
  0x44   : > { %s2000_s28 = scalar_lea.hbm %s2445_s20, 64  ;;  %p2456_p13 = pneg %p2436_p9 }
  0x45   : > { %p2001_p2 = scmp.ne.s32.totalorder %s2445_s20, %s2000_s28  ;;  %s2005_s12 = scalar_lea.hbm %s2796_s1, 128 }
  0x46   : > { %p2006_p3 = scmp.lt.s32.totalorder %s2445_s20, %s2796_s1  ;;  %p2007_p7 = scmp.lt.s32.totalorder %s2005_s12, %s2000_s28 }
  0x47   : > { %p2003_p0 = pnand %p2456_p13, %p2001_p2 }
  0x48   : > { %p2008_p1 = por %p2007_p7, %p2006_p3 }
  0x49   : > { %p2004_p5 = pneg %p2003_p0 }
  0x4b   : > { %p2009_p12 = pnand %p2008_p1, %p2004_p5 }
  0x4d   : > { %2012 = shalt.err (!%p2009_p12)
}
  0x4e   : > { %s2013_s19 = scalar_lea.vmem %s444_s23, 64  ;;  %s2254_s11 = smov [#allocation5]  }
  0x4f   : > { %p2014_p6 = scmp.ne.s32.totalorder %s444_s23, %s2013_s19  ;;  %s2018_s10 = sshll.u32 %s2254_s11, 4  ;;  %s2019_s10 = int_to_ptr.vmem [resolvable:$false] %s2018_s10 }
  0x50   : > { %s2020_s5 = scalar_lea.vmem %s2019_s10, 128  ;;  %p2021_p2 = scmp.lt.s32.totalorder %s444_s23, %s2019_s10 }
  0x51   : > { %p2016_p10 = pnand %p2014_p6, %p2456_p13  ;;  %p2022_p0 = scmp.lt.s32.totalorder %s2020_s5, %s2013_s19 }
  0x53   : > { %p2017_p4 = pneg %p2016_p10  ;;  %p2023_p8 = por %p2022_p0, %p2021_p2 }
  0x55   : > { %p2024_p11 = pnand %p2023_p8, %p2017_p4 }
  0x57   : > { %2027 = shalt.err (!%p2024_p11)
}
  0x58   : > { %1862 = dma.hbm_to_vmem [thread:$0]  (!%p2436_p9), %s2445_s20, 64, %s444_s23, %s2450_s13  }
  0x59   : > { %s2255_s12 = smov [#allocation13]   ;;  %s2256_s30 = smov [#allocation14]  }
  0x5a   : > { %s383_s28 = sshll.u32 %s2255_s12, 4  ;;  %s397_s4 = sshll.u32 %s2256_s30, 4  ;;  %s384_s28 = int_to_ptr.vmem [resolvable:$true] %s383_s28  ;;  %s398_s4 = int_to_ptr.vmem [resolvable:$true] %s397_s4 }
  0x5b   : > { %s2039_s6 = scalar_lea.vmem %s384_s28, 256  ;;  %p2848_p6 = scmp.ne.s32.totalorder %s2839_s14, 0 }
  0x5c   : > { %p2040_p1 = scmp.ne.s32.totalorder %s384_s28, %s2039_s6  ;;  %p2047_p3 = scmp.lt.s32.totalorder %s384_s28, %s384_s28 }
  0x5d   : > { %p2849_p12 = pneg %p2848_p6  ;;  %p2048_p4 = scmp.lt.s32.totalorder %s2039_s6, %s2039_s6 }
  0x5f   : > { %p2042_p10 = pnand %p2040_p1, %p2849_p12  ;;  %p2049_p8 = por %p2048_p4, %p2047_p3 }
  0x61   : > { %p2043_p5 = pneg %p2042_p10 }
  0x63   : > { %p2050_p11 = pnand %p2049_p8, %p2043_p5 }
  0x65   : > { %2053 = shalt.err (!%p2050_p11)
}
  0x66   : > { %s2850_s5 = smov 4   ;;  %s2851_s10 = smov 64  }
  0x67   : > { %1852 = dma.hbm_to_vmem [thread:$0]  (!%p2848_p6), %s2803_s8, 256, %s384_s28, [#allocation12], %s2851_s10, %s2851_s10, %s2850_s5  }
  0x68   : > { %s2065_s19 = scalar_lea.vmem %s398_s4, 16  ;;  %p2852_p2 = pmov %p2849_p12 }
  0x69   : > { %p2066_p7 = scmp.ne.s32.totalorder %s398_s4, %s2065_s19  ;;  %s2072_s20 = scalar_lea.vmem %s398_s4, 32 }
  0x6a   : > { %p2073_p12 = scmp.lt.s32.totalorder %s398_s4, %s398_s4  ;;  %p2074_p10 = scmp.lt.s32.totalorder %s2072_s20, %s2065_s19 }
  0x6b   : > { %p2068_p0 = pnand %p2066_p7, %p2852_p2 }
  0x6c   : > { %p2075_p5 = por %p2074_p10, %p2073_p12 }
  0x6d   : > { %p2069_p1 = pneg %p2068_p0 }
  0x6f   : > { %p2076_p3 = pnand %p2075_p5, %p2069_p1 }
  0x71   : > { %2079 = shalt.err (!%p2076_p3)
}
  0x72   : > { %1855 = dma.hbm_to_vmem [thread:$0]  (!%p2848_p6), %s2804_s9, 16, %s398_s4, [#allocation15]  }
  0x73   : > { %s2498_s6 = scalar_lea.hbm %s2795_s0, %s2434_s18  ;;  %s418_s5 = scalar_lea.vmem [#allocation2], %s2431_s16 }
  0x74   : > { %s425_s10 = sshll.u32 %s418_s5, 4  ;;  %s2505_s23 = scalar_lea.hbm %s2797_s2, %s2434_s18  ;;  %s426_s10 = int_to_ptr.vmem [resolvable:$true] %s425_s10 }
  0x75   : > { %s415_s19 = scalar_lea.sflag [#allocation3], %s2428_s17  ;;  %s2080_s20 = scalar_lea.hbm %s2498_s6, 64 }
  0x76   : > { %p2081_p4 = scmp.ne.s32.totalorder %s2498_s6, %s2080_s20  ;;  %s2085_s12 = scalar_lea.hbm %s2795_s0, 128 }
  0x77   : > { %p2086_p11 = scmp.lt.s32.totalorder %s2498_s6, %s2795_s0  ;;  %p2087_p7 = scmp.lt.s32.totalorder %s2085_s12, %s2080_s20 }
  0x78   : > { %p2083_p6 = pnand %p2081_p4, %p2456_p13 }
  0x79   : > { %p2088_p2 = por %p2087_p7, %p2086_p11 }
  0x7a   : > { %p2084_p8 = pneg %p2083_p6 }
  0x7c   : > { %p2089_p0 = pnand %p2088_p2, %p2084_p8 }
  0x7e   : > { %2092 = shalt.err (!%p2089_p0)
}
  0x7f   : > { %s2093_s18 = scalar_lea.vmem %s426_s10, 64  ;;  %s2257_s5 = smov [#allocation2]  }
  0x80   : > { %p2094_p1 = scmp.ne.s32.totalorder %s426_s10, %s2093_s18  ;;  %s2098_s14 = sshll.u32 %s2257_s5, 4  ;;  %s2099_s14 = int_to_ptr.vmem [resolvable:$false] %s2098_s14 }
  0x81   : > { %s2100_s11 = scalar_lea.vmem %s2099_s14, 128  ;;  %p2101_p5 = scmp.lt.s32.totalorder %s426_s10, %s2099_s14 }
  0x82   : > { %p2096_p12 = pnand %p2094_p1, %p2456_p13  ;;  %p2102_p3 = scmp.lt.s32.totalorder %s2100_s11, %s2093_s18 }
  0x84   : > { %p2097_p10 = pneg %p2096_p12  ;;  %p2103_p4 = por %p2102_p3, %p2101_p5 }
  0x86   : > { %p2104_p6 = pnand %p2103_p4, %p2097_p10 }
  0x88   : > { %2107 = shalt.err (!%p2104_p6)
}
  0x89   : > { %1859 = dma.hbm_to_vmem [thread:$0]  (!%p2436_p9), %s2498_s6, 64, %s426_s10, %s415_s19  }
  0x8a   : > { %s454_s20 = scalar_lea.vmem [#allocation7], %s2431_s16  ;;  %s1647_s15 = sshll.u32 %s2428_s17, 1 }
  0x8b   : > { %s461_s4 = sshll.u32 %s454_s20, 4  ;;  %s2108_s12 = scalar_lea.hbm %s2505_s23, 64  ;;  %s462_s4 = int_to_ptr.vmem [resolvable:$true] %s461_s4 }
  0x8c   : > { %p2109_p8 = scmp.ne.s32.totalorder %s2505_s23, %s2108_s12  ;;  %s2113_s18 = scalar_lea.hbm %s2797_s2, 128 }
  0x8d   : > { %p2114_p2 = scmp.lt.s32.totalorder %s2505_s23, %s2797_s2  ;;  %p2115_p0 = scmp.lt.s32.totalorder %s2113_s18, %s2108_s12 }
  0x8e   : > { %p2111_p11 = pnand %p2109_p8, %p2456_p13 }
  0x8f   : > { %p2116_p1 = por %p2115_p0, %p2114_p2 }
  0x90   : > { %p2112_p7 = pneg %p2111_p11 }
  0x92   : > { %p2117_p12 = pnand %p2116_p1, %p2112_p7 }
  0x94   : > { %2120 = shalt.err (!%p2117_p12)
}
  0x95   : > { %s2121_s16 = scalar_lea.vmem %s462_s4, 64  ;;  %s2258_s17 = smov [#allocation7]  }
  0x96   : > { %p2122_p10 = scmp.ne.s32.totalorder %s462_s4, %s2121_s16  ;;  %s2126_s6 = sshll.u32 %s2258_s17, 4  ;;  %s2127_s6 = int_to_ptr.vmem [resolvable:$false] %s2126_s6 }
  0x97   : > { %s2128_s10 = scalar_lea.vmem %s2127_s6, 128  ;;  %p2129_p4 = scmp.lt.s32.totalorder %s462_s4, %s2127_s6 }
  0x98   : > { %p2124_p5 = pnand %p2122_p10, %p2456_p13  ;;  %p2130_p6 = scmp.lt.s32.totalorder %s2128_s10, %s2121_s16 }
  0x9a   : > { %p2125_p3 = pneg %p2124_p5  ;;  %p2131_p8 = por %p2130_p6, %p2129_p4 }
  0x9c   : > { %p2132_p11 = pnand %p2131_p8, %p2125_p3 }
  0x9e   : > { %2135 = shalt.err (!%p2132_p11)
}
  0x9f   : > { %1865 = dma.hbm_to_vmem [thread:$0]  (!%p2436_p9), %s2505_s23, 64, %s462_s4, %s2450_s13  }
  0xa0   : > { %s1648_s19 = sshll.u32 %s2248_s24, 5  ;;  %s472_s11 = scalar_lea.vmem [#allocation8], %s1647_s15 }
  0xa1   : > { %s479_s20 = sshll.u32 %s472_s11, 4  ;;  %s477_s30 = scalar_lea.hbm %s2798_s3, %s1648_s19  ;;  %s480_s20 = int_to_ptr.vmem [resolvable:$true] %s479_s20 }
  0xa2   : > { %s2853_s18 = sand.u32 1, %s2248_s24   ;;  %s2136_s14 = scalar_lea.hbm %s477_s30, 32 }
  0xa3   : > { %s469_s5 = scalar_lea.sflag [#allocation9], %s2853_s18  ;;  %p2137_p7 = scmp.ne.s32.totalorder %s477_s30, %s2136_s14 }
  0xa4   : > { %s2141_s6 = scalar_lea.hbm %s2798_s3, 64  ;;  %p2142_p1 = scmp.lt.s32.totalorder %s477_s30, %s2798_s3 }
  0xa5   : > { %p2139_p2 = pnand %p2137_p7, %p2456_p13  ;;  %p2143_p12 = scmp.lt.s32.totalorder %s2141_s6, %s2136_s14 }
  0xa7   : > { %p2140_p0 = pneg %p2139_p2  ;;  %p2144_p10 = por %p2143_p12, %p2142_p1 }
  0xa9   : > { %p2145_p5 = pnand %p2144_p10, %p2140_p0 }
  0xab   : > { %2148 = shalt.err (!%p2145_p5)
}
  0xac   : > { %s2149_s4 = scalar_lea.vmem %s480_s20, 32  ;;  %s2259_s15 = smov [#allocation8]  }
  0xad   : > { %p2150_p3 = scmp.ne.s32.totalorder %s480_s20, %s2149_s4  ;;  %s2154_s10 = sshll.u32 %s2259_s15, 4  ;;  %s2155_s10 = int_to_ptr.vmem [resolvable:$false] %s2154_s10 }
  0xae   : > { %s2156_s19 = scalar_lea.vmem %s2155_s10, 64  ;;  %p2157_p8 = scmp.lt.s32.totalorder %s480_s20, %s2155_s10 }
  0xaf   : > { %p2152_p4 = pnand %p2150_p3, %p2456_p13  ;;  %p2158_p11 = scmp.lt.s32.totalorder %s2156_s19, %s2149_s4 }
  0xb1   : > { %p2153_p6 = pneg %p2152_p4  ;;  %p2159_p7 = por %p2158_p11, %p2157_p8 }
  0xb3   : > { %p2160_p2 = pnand %p2159_p7, %p2153_p6 }
  0xb5   : > { %2163 = shalt.err (!%p2160_p2)
}
  0xb6   : > { %1868 = dma.hbm_to_vmem [thread:$0]  (!%p2436_p9), %s477_s30, 32, %s480_s20, %s469_s5  }
  0xb7   : > { %p2854_p0 = scmp.ne.s32.totalorder %s2838_s29, 0 }
  0xb8   : > { %s2564_s21 = sand.u32 (!%p2854_p0), 1, %s2240_s22   ;;  %p2855_p13 = scmp.ne.s32.totalorder (!%p2854_p0), %s2835_s27, 0 }
  0xb9   : > { %488 = sbr.rel (%p2854_p0) target bundleno = 2681 (0xa79), region = 68  ;;  %s2567_s11 = sshll.u32 (!%p2854_p0), %s2564_s21, 2 }
  0xba   : > { %s491_s12 = scalar_lea.sflag (!%p2854_p0), [#allocation3], %s2564_s21  ;;  %s494_s28 = scalar_lea.vmem (!%p2854_p0), [#allocation2], %s2567_s11 }
  0xbe   : > { %2207 = dma.done.wait (%p2855_p13), %s491_s12, 64  }
  0xbf   : > { %2209 = vsyncadd (%p2855_p13), %s491_s12, 4294967232  ;;  %s499_s29 = sand.u32 1, %s2352_s25   ;;  %s503_s20 = scalar_lea.vmem [#allocation5], %s2567_s11 }
  0xc0   : > { %s500_s26 = scalar_lea.sflag [#allocation6], %s499_s29 }
  0xc1   : > { %2211 = dma.done.wait (%p2855_p13), %s500_s26, 128  }
  0xc2   : > { %2213 = vsyncadd (%p2855_p13), %s500_s26, 4294967168  ;;  %s1653_s30 = sshll.u32 %s2564_s21, 1  ;;  %s512_s18 = scalar_lea.vmem [#allocation7], %s2567_s11 }
  0xc3   : > { %s518_s5 = scalar_lea.sflag [#allocation9], %s499_s29  ;;  %s2583_s14 = scalar_lea.vmem [#allocation8], %s1653_s30 }
  0xc4   : > { %2215 = dma.done.wait (%p2855_p13), %s518_s5, 32  }
  0xc5   : > { %2217 = vsyncadd (%p2855_p13), %s518_s5, 4294967264  ;;  %p2856_p9 = scmp.eq.s32.totalorder %s2352_s25, 0 }
  0xc7   : > { %2219 = dma.done.wait (%p2856_p9), [#allocation9], 256   ;;  %p2857_p1 = pmov %p2856_p9 }
  0xc9   : > { %2221 = vsyncadd (%p2857_p1), [#allocation9], 4294967040  ;;  %p2858_p12 = pmov %p2857_p1 }
  0xca   : > { %p2859_p10 = pmov %p2857_p1 }
  0xcb   : > { %2223 = dma.done.wait (%p2858_p12), [#allocation12], 512  }
  0xcc   : > { %2225 = vsyncadd (%p2859_p10), [#allocation12], 4294966784  ;;  %p2860_p5 = pmov %p2857_p1 }
  0xcd   : > { %p2861_p3 = pmov %p2857_p1 }
  0xce   : > { %2227 = dma.done.wait (%p2860_p5), [#allocation15], 16  }
  0xcf   : > { %2229 = vsyncadd (%p2861_p3), [#allocation15], 4294967280  ;;  %v2260_v0 = vmov 0.0   ;;  %vm2261_vm0 = vmmov 0   ;;  %v1926_v1 = vld [vmem:[#allocation11 + $0x8] sm:$0xff]   ;;  %v1927_v2 = vld [vmem:[#allocation10 + $0x8] sm:$0xff]  }
  0xd0   : > { %1729 = vmatprep.subr.bf16.mxu1 %v2260_v0  ;;  %1721 = vmatprep.subr.bf16.mxu0 %v2260_v0  ;;  %v1928_v3 = vld [vmem:[#allocation11] sm:$0xff]   ;;  %v1929_v4 = vld [vmem:[#allocation10] sm:$0xff]   ;;  %vm618_vm1 = vcmask 261120   ;;  %s2862_s13 = sld [smem:[#allocation31_spill]]  ;;  %vm808_vm2 = vcmask 64512   ;;  %s2262_s23 = smov 120  }
  0xd1   : > { %1733 = vmatprep.mubr.msk.bf16.mxu1 %vm2261_vm0, %v2260_v0  ;;  %1725 = vmatprep.mubr.msk.bf16.mxu0 %vm2261_vm0, %v2260_v0  ;;  %v663_v5 = vld [vmem:[%s503_s20] sm:$0xf]  ;;  %v594_v6 = vld [vmem:[%s494_s28] sm:$0xf]  ;;  %v1663_v7 = vld [vmem:[%s2802_s7] ss:$0 sm:$0xff] }
  0xd2   : > { %1730 = vmatpush3.bf16.msra.mxu1 %v1926_v1  ;;  %1722 = vmatpush3.bf16.msra.mxu0 %v1927_v2  ;;  %v1930_v23 = vld [vmem:[#allocation13 + $0x8] sm:$0xff]   ;;  %v1931_v24 = vld [vmem:[#allocation13] sm:$0xff]   ;;  %v730_v25 = vld [vmem:[%s512_s18] sm:$0xf]  ;;  %vm870_vm4 = vcmask 1043456   ;;  %s2263_s4 = smov 112  }
  0xd3   : > { %1731 = vmatprep.subr.bf16.mxu1 %v2260_v0  ;;  %1723 = vmatprep.subr.bf16.mxu0 %v2260_v0  ;;  %v800_v29 = vld [vmem:[%s2583_s14] sm:$0x3]  ;;  %v1667_v53 = vld [vmem:[#allocation14] ss:$0 sm:$0xff]  ;;  %s2863_s19 = sld [smem:[#allocation33_spill]]  ;;  %s2264_s28 = smov 104  }
  0xd4   : > { %v801_v30 = vunpack.c.0.s8 %v800_v29  ;;  %s1658_s18 = sshll.u32 %s2564_s21, 3  ;;  %s2864_s27 = sld [smem:[#allocation34_spill]] }
  0xd5   : > { %s2865_s16 = sld [smem:[#allocation28_spill]]  ;;  %s1685_s17 = sshll.u32 %s2352_s25, 7 }
  0xd6   : > { %1732 = vmatpush3.bf16.msra.mxu1 %v1928_v3  ;;  %1724 = vmatpush3.bf16.msra.mxu0 %v1929_v4  ;;  %v1659_v8 = vld [vmem:[%s2862_s13] ss:$0 sm:$0xff]  ;;  %vm802_vm3 = vcmp.eq.s32.totalorder %v801_v30, 0  ;;  %s592_s6 = scalar_lea.vmem [#allocation16], %s1658_s18  ;;  %s2866_s15 = sld [smem:[#allocation35_spill]] }
  0xd7   : > { %1745 = vmatprep.subr.bf16.mxu1 %v2260_v0  ;;  %1737 = vmatprep.subr.bf16.mxu0 %v2260_v0  ;;  %v2656_v31 = vsel %vm802_vm3, -1e+30, %v2260_v0  ;;  %s1460_s13 = sshll.u32 %s592_s6, 4  ;;  %s1447_s25 = scalar_lea.sflag [#allocation4], %s2564_s21  ;;  %s2753_s13 = int_to_ptr.vmem [resolvable:$true] %s1460_s13 }
  0xd8   : > { %s2164_s11 = scalar_lea.vmem %s2753_s13, 128  ;;  %s2265_s12 = smov [#allocation16]  }
  0xd9   : > { %1734 = vmatmul.mubr.msk.bf16.vlgmr.msra.gmra.mxu1 %vm618_vm1, %v663_v5  ;;  %1726 = vmatmul.mubr.msk.bf16.vlgmr.msra.gmra.mxu0 %vm618_vm1, %v594_v6  ;;  %v805_v3 = vld [vmem:[%s2863_s19 + $0x4] sm:$0xf]  ;;  %p2165_p4 = scmp.ne.s32.totalorder %s2753_s13, %s2164_s11 }
  0xda   : > { %1747 = vmatprep.mubr.msk.bf16.mxu1 %vm2261_vm0, %v2260_v0  ;;  %1741 = vmatprep.mubr.msk.bf16.mxu0 %vm2261_vm0, %v2260_v0  ;;  %v1033_v4 = vsel %vm870_vm4, %v805_v3, 0 }
  0xdb   : > { %1738 = vmatpush3.bf16.msra.mxu0 %v1930_v23  ;;  %p2867_p6 = scmp.ne.s32.totalorder %s2865_s16, 0 }
  0xdc   : > { %1739 = vmatprep.subr.bf16.mxu0 %v2260_v0  ;;  %s2751_s10 = scalar_lea.hbm %s2866_s15, %s1685_s17 }
  0xdd   : > { %p2166_p8 = pnand %p2165_p4, %p2867_p6 }
  0xdf   : > { %1740 = vmatpush3.bf16.msra.mxu0 %v1931_v24  ;;  %p2167_p11 = pneg %p2166_p8 }
  0xe0   : > { %1751 = vmatprep.subr.bf16.mxu0 %v2260_v0 }
  0xe2   : > { %1742 = vmatmul.mubr.msk.bf16.vlgmr.msra.gmra.mxu0 %vm618_vm1, %v730_v25 }
  0xe3   : > { %1753 = vmatprep.mubr.msk.bf16.mxu0 %vm2261_vm0, %v2260_v0 }
 0x199   : > { %v724_v9 = vpop.f32.mrf.mxu1  ;;  %v656_v11 = vpop.f32.mrf.mxu0 }
 0x19a   : > { %v725_v10 = vadd.f32 %v1663_v7, %v724_v9  ;;  %v657_v12 = vadd.f32 %v1659_v8, %v656_v11  ;;  %v804_v9 = vld [vmem:[%s2863_s19] sm:$0xf] }
 0x19b   : > { %v1735_v13 = vpop.f32.mrf.mxu1  ;;  %v1727_v15 = vpop.f32.mrf.mxu0 }
 0x19c   : > { %v2627_v14 = vpack.c.bf16 %v725_v10, %v725_v10  ;;  %v662_v16 = vmul.f32 0.35355338, %v657_v12  ;;  %v1079_v12 = vsel %vm870_vm4, %v804_v9, 0 }
 0x19d   : > { %v727_v17 = vpop.f32.mrf.mxu1  ;;  %v659_v18 = vpop.f32.mrf.mxu0 }
 0x19e   : > { %919 = vrot.lane.b32.xlu0 %v2627_v14, %s2262_s23  ;;  %v813_v19 = vsel %vm808_vm2, %v2627_v14, 0  ;;  %v2633_v20 = vpack.c.bf16 %v662_v16, %v662_v16 }
 0x19f   : > { %v1736_v21 = vpop.f32.mrf.mxu1  ;;  %1746 = vmatpush3.bf16.xpose.msra.mxu1 %v813_v19  ;;  %v1728_v22 = vpop.f32.mrf.mxu0 }
 0x1a0   : > { %1757 = vmatprep.subr.bf16.mxu1 %v2260_v0 }
 0x1a2   : > { %916 = vrot.lane.b32.xlu0 %v2633_v20, %s2262_s23  ;;  %v791_v47 = vpop.f32.mrf.mxu0 }
 0x1a3   : > { %v792_v54 = vadd.f32 %v1667_v53, %v791_v47 }
 0x1a4   : > { %v1743_v48 = vpop.f32.mrf.mxu0 }
 0x1a5   : > { %v2663_v55 = vpack.c.bf16 %v792_v54, %v792_v54 }
 0x1a6   : > { %1748 = vmatmul.mubr.msk.bf16.vlgmr.msra.gmra.mxu1 %vm808_vm2, %v2633_v20  ;;  %v794_v49 = vpop.f32.mrf.mxu0 }
 0x1a7   : > { %1759 = vmatprep.mubr.msk.bf16.mxu1 %vm2261_vm0, %v2260_v0  ;;  %v872_v56 = vsel %vm870_vm4, %v2663_v55, 0 }
 0x1a8   : > { %v1744_v50 = vpop.f32.mrf.mxu0  ;;  %1752 = vmatpush3.bf16.msra.mxu0 %v872_v56 }
 0x1a9   : > { %1763 = vmatprep.subr.bf16.mxu0 %v2260_v0 }
 0x210   : > { %v920_v26 = vpop.permute.xlu0 %919 }
 0x211   : > { %v925_v27 = vsel %vm808_vm2, %v920_v26, 0 }
 0x212   : > { %1758 = vmatpush3.bf16.xpose.msra.mxu1 %v925_v27 }
 0x213   : > { %1769 = vmatprep.subr.bf16.mxu1 %v2260_v0 }
 0x214   : > { %v917_v28 = vpop.permute.xlu0 %916 }
 0x219   : > { %1760 = vmatmul.mubr.msk.bf16.vlgmr.msra.gmra.mxu1 %vm808_vm2, %v917_v28 }
 0x21a   : > { %1771 = vmatprep.mubr.msk.bf16.mxu1 %vm2261_vm0, %v2260_v0  ;;  %1770 = vmatpush3.bf16.msra.mxu1 %v1033_v4 }
 0x21b   : > { %1781 = vmatprep.subr.bf16.mxu1 %v2260_v0 }
 0x266   : > { %v849_v32 = vpop.f32.mrf.mxu1 }
 0x267   : > { %v850_v33 = vadd.f32 %v849_v32, %v2656_v31 }
 0x268   : > { %v1749_v34 = vpop.f32.mrf.mxu1 }
 0x269   : > { %v855_v35 = vsel %vm808_vm2, %v850_v33, -inf }
 0x26a   : > { %856 = vmax.xlane.f32.xlu1 %v855_v35  ;;  %v852_v36 = vpop.f32.mrf.mxu1 }
 0x26c   : > { %v1750_v37 = vpop.f32.mrf.mxu1 }
 0x2d9   : > { %v961_v38 = vpop.f32.mrf.mxu1 }
 0x2da   : > { %v962_v39 = vadd.f32 %v961_v38, %v2656_v31 }
 0x2db   : > { %v1761_v40 = vpop.f32.mrf.mxu1 }
 0x2dc   : > { %v967_v41 = vsel %vm808_vm2, %v962_v39, -inf }
 0x2dd   : > { %968 = vmax.xlane.f32.xlu1 %v967_v41  ;;  %v964_v42 = vpop.f32.mrf.mxu1 }
 0x2df   : > { %v1762_v43 = vpop.f32.mrf.mxu1 }
 0x2f3   : > { %v857_v44 = vpop.xlane.xlu1 %856 }
 0x2f4   : > { %v858_v45 = vsub.f32 %v850_v33, %v857_v44 }
 0x2f6   : > { %v859_v46 = vmul.f32 1.442695, %v858_v45 }
 0x2f8   : > { %1932 = vpow2.f32 %v859_v46 }
 0x305   : > { %v1933_v51 = vpop.eup %1932 }
 0x306   : > { %v861_v52 = vsel %vm808_vm2, %v1933_v51, 0.0 }
 0x307   : > { %862 = vadd.xlane.f32.xlu0 %v861_v52 }
 0x31d   : > { %1183 = vrot.lane.b32.xlu0 %v2663_v55, %s2263_s4 }
 0x366   : > { %v969_v57 = vpop.xlane.xlu1 %968 }
 0x367   : > { %v970_v58 = vsub.f32 %v962_v39, %v969_v57 }
 0x369   : > { %v971_v59 = vmul.f32 1.442695, %v970_v58 }
 0x36b   : > { %1934 = vpow2.f32 %v971_v59 }
 0x378   : > { %v1935_v60 = vpop.eup %1934 }
 0x379   : > { %v973_v61 = vsel %vm808_vm2, %v1935_v60, 0.0 }
 0x37a   : > { %974 = vadd.xlane.f32.xlu1 %v973_v61 }
 0x38b   : > { %980 = vrot.lane.b32.xlu1 %v2663_v55, %s2262_s23 }
 0x38f   : > { %1123 = vrot.lane.b32.xlu1 %v2627_v14, %s2263_s4 }
 0x390   : > { %v863_v62 = vpop.xlane.xlu0 %862 }
 0x391   : > { %1936 = vrcp.f32 %v863_v62 }
 0x393   : > { %1121 = vrot.lane.b32.xlu1 %v2633_v20, %s2263_s4 }
 0x394   : > { %v1184_v13 = vpop.permute.xlu0 %1183 }
 0x395   : > { %v1189_v18 = vsel %vm870_vm4, %v1184_v13, 0  ;;  %v807_v13 = vld [vmem:[%s2863_s19 + $0xc] sm:$0xf] }
 0x39e   : > { %v1937_v63 = vpop.eup %1936 }
 0x39f   : > { %v865_v1 = vmul.f32 %v1937_v63, %v1933_v51 }
 0x3a1   : > { %v866_v2 = vpack.c.bf16 %v865_v1, %v865_v1 }
 0x3a3   : > { %1754 = vmatmul.mubr.msk.bf16.vlgmr.msra.gmra.mxu0 %vm808_vm2, %v866_v2 }
 0x3a4   : > { %1765 = vmatprep.mubr.msk.bf16.mxu0 %vm2261_vm0, %v2260_v0 }
 0x403   : > { %v975_v5 = vpop.xlane.xlu1 %974 }
 0x404   : > { %1938 = vrcp.f32 %v975_v5 }
 0x407   : > { %v981_v6 = vpop.permute.xlu1 %980 }
 0x408   : > { %v986_v7 = vsel %vm870_vm4, %v981_v6, 0 }
 0x409   : > { %1764 = vmatpush3.bf16.msra.mxu0 %v986_v7 }
 0x40a   : > { %1775 = vmatprep.subr.bf16.mxu0 %v2260_v0 }
 0x40b   : > { %v1124_v22 = vpop.permute.xlu1 %1123 }
 0x40c   : > { %v1129_v26 = vsel %vm808_vm2, %v1124_v22, 0 }
 0x40f   : > { %v1122_v29 = vpop.permute.xlu1 %1121 }
 0x411   : > { %v1939_v8 = vpop.eup %1938 }
 0x412   : > { %v977_v10 = vmul.f32 %v1939_v8, %v1935_v60 }
 0x414   : > { %v978_v11 = vpack.c.bf16 %v977_v10, %v977_v10 }
 0x416   : > { %1766 = vmatmul.mubr.msk.bf16.vlgmr.msra.gmra.mxu0 %vm808_vm2, %v978_v11 }
 0x417   : > { %1776 = vmatpush3.bf16.msra.mxu0 %v1079_v12  ;;  %1777 = vmatprep.mubr.msk.bf16.mxu0 %vm2261_vm0, %v2260_v0 }
 0x418   : > { %1787 = vmatprep.subr.bf16.mxu0 %v2260_v0 }
 0x463   : > { %v908_v15 = vpop.f32.mrf.mxu0 }
 0x464   : > { %v914_v16 = vpack.c.bf16 %v908_v15, %v908_v15  ;;  %v1394_v15 = vsel %vm870_vm4, %v807_v13, 0 }
 0x465   : > { %v1755_v17 = vpop.f32.mrf.mxu0 }
 0x466   : > { %1778 = vmatmul.mubr.msk.bf16.vlgmr.msra.gmra.mxu0 %vm808_vm2, %v914_v16 }
 0x467   : > { %1788 = vmatpush3.bf16.msra.mxu0 %v1189_v18  ;;  %v911_v19 = vpop.f32.mrf.mxu0  ;;  %1789 = vmatprep.mubr.msk.bf16.mxu0 %vm2261_vm0, %v2260_v0 }
 0x468   : > { %1799 = vmatprep.subr.bf16.mxu0 %v2260_v0 }
 0x469   : > { %v1756_v21 = vpop.f32.mrf.mxu0 }
 0x4d6   : > { %v1022_v23 = vpop.f32.mrf.mxu0 }
 0x4d7   : > { %v1028_v24 = vpack.c.bf16 %v1022_v23, %v1022_v23 }
 0x4d8   : > { %v1767_v25 = vpop.f32.mrf.mxu0 }
 0x4d9   : > { %1772 = vmatmul.mubr.msk.bf16.vlgmr.msra.gmra.mxu1 %vm808_vm2, %v1028_v24 }
 0x4da   : > { %1782 = vmatpush3.bf16.xpose.msra.mxu1 %v1129_v26  ;;  %v1025_v27 = vpop.f32.mrf.mxu0  ;;  %1783 = vmatprep.mubr.msk.bf16.mxu1 %vm2261_vm0, %v2260_v0 }
 0x4db   : > { %1793 = vmatprep.subr.bf16.mxu1 %v2260_v0 }
 0x4dc   : > { %v1768_v28 = vpop.f32.mrf.mxu0 }
 0x4e1   : > { %1784 = vmatmul.mubr.msk.bf16.vlgmr.msra.gmra.mxu1 %vm808_vm2, %v1122_v29 }
 0x4e2   : > { %1795 = vmatprep.mubr.msk.bf16.mxu1 %vm2261_vm0, %v2260_v0 }
 0x526   : > { %v2705_v30 = vpop.f32.mrf.mxu0 }
 0x528   : > { %v1779_v32 = vpop.f32.mrf.mxu0 }
 0x52a   : > { %v1118_v33 = vpop.f32.mrf.mxu0 }
 0x52c   : > { %v1780_v34 = vpop.f32.mrf.mxu0 }
 0x599   : > { %v1069_v35 = vpop.f32.mrf.mxu1 }
 0x59b   : > { %v1773_v36 = vpop.f32.mrf.mxu1 }
 0x59d   : > { %v1072_v37 = vpop.f32.mrf.mxu1 }
 0x59f   : > { %v1774_v38 = vpop.f32.mrf.mxu1 }
 0x5a1   : > { %v1165_v39 = vpop.f32.mrf.mxu1 }
 0x5a2   : > { %v1166_v40 = vadd.f32 %v1165_v39, %v2656_v31 }
 0x5a3   : > { %v1785_v41 = vpop.f32.mrf.mxu1 }
 0x5a4   : > { %v1171_v42 = vsel %vm808_vm2, %v1166_v40, -inf }
 0x5a5   : > { %1172 = vmax.xlane.f32.xlu1 %v1171_v42  ;;  %v1168_v43 = vpop.f32.mrf.mxu1 }
 0x5a7   : > { %v1786_v44 = vpop.f32.mrf.mxu1 }
 0x62e   : > { %v1173_v45 = vpop.xlane.xlu1 %1172 }
 0x62f   : > { %v1174_v46 = vsub.f32 %v1166_v40, %v1173_v45 }
 0x631   : > { %v1175_v47 = vmul.f32 1.442695, %v1174_v46 }
 0x633   : > { %1940 = vpow2.f32 %v1175_v47 }
 0x640   : > { %v1941_v48 = vpop.eup %1940 }
 0x641   : > { %v1177_v49 = vsel %vm808_vm2, %v1941_v48, 0.0 }
 0x642   : > { %1178 = vadd.xlane.f32.xlu0 %v1177_v49 }
 0x658   : > { %1281 = vrot.lane.b32.xlu0 %v2627_v14, %s2264_s28 }
 0x65c   : > { %1279 = vrot.lane.b32.xlu0 %v2633_v20, %s2264_s28  ;;  %v806_v20 = vld [vmem:[%s2863_s19 + $0x8] sm:$0xf] }
 0x65d   : > { %v1236_v57 = vsel %vm870_vm4, %v806_v20, 0 }
 0x65e   : > { %1794 = vmatpush3.bf16.msra.mxu1 %v1236_v57 }
 0x65f   : > { %1805 = vmatprep.subr.bf16.mxu1 %v2260_v0 }
 0x6cb   : > { %v1179_v50 = vpop.xlane.xlu0 %1178 }
 0x6cc   : > { %1942 = vrcp.f32 %v1179_v50 }
 0x6cf   : > { %v1282_v53 = vpop.permute.xlu0 %1281 }
 0x6d0   : > { %v1287_v56 = vsel %vm808_vm2, %v1282_v53, 0 }
 0x6d3   : > { %v1280_v14 = vpop.permute.xlu0 %1279 }
 0x6d9   : > { %v1943_v51 = vpop.eup %1942 }
 0x6da   : > { %v1181_v52 = vmul.f32 %v1943_v51, %v1941_v48 }
 0x6dc   : > { %v1182_v54 = vpack.c.bf16 %v1181_v52, %v1181_v52 }
 0x6de   : > { %1790 = vmatmul.mubr.msk.bf16.vlgmr.msra.gmra.mxu0 %vm808_vm2, %v1182_v54 }
 0x6df   : > { %1800 = vmatpush3.bf16.xpose.msra.mxu0 %v1287_v56  ;;  %1801 = vmatprep.mubr.msk.bf16.mxu0 %vm2261_vm0, %v2260_v0 }
 0x6e0   : > { %1811 = vmatprep.subr.bf16.mxu0 %v2260_v0 }
 0x6e6   : > { %1802 = vmatmul.mubr.msk.bf16.vlgmr.msra.gmra.mxu0 %vm808_vm2, %v1280_v14 }
 0x6e7   : > { %1813 = vmatprep.mubr.msk.bf16.mxu0 %vm2261_vm0, %v2260_v0  ;;  %1812 = vmatpush3.bf16.msra.mxu0 %v1394_v15 }
 0x79e   : > { %v1225_v58 = vpop.f32.mrf.mxu0 }
 0x79f   : > { %v1231_v59 = vpack.c.bf16 %v1225_v58, %v1225_v58 }
 0x7a0   : > { %v1791_v60 = vpop.f32.mrf.mxu0 }
 0x7a1   : > { %1796 = vmatmul.mubr.msk.bf16.vlgmr.msra.gmra.mxu1 %vm808_vm2, %v1231_v59 }
 0x7a2   : > { %v1228_v61 = vpop.f32.mrf.mxu0  ;;  %1807 = vmatprep.mubr.msk.bf16.mxu1 %vm2261_vm0, %v2260_v0  ;;  %v1116_v0 = vadd.f32 %v2705_v30, %v1069_v35  ;;  %v1683_v30 = vld [vmem:[%s2864_s27] ss:$0 sm:$0xff] }
 0x7a4   : > { %v1792_v62 = vpop.f32.mrf.mxu0 }
 0x7a6   : > { %v1323_v63 = vpop.f32.mrf.mxu0 }
 0x7a7   : > { %v1324_v1 = vadd.f32 %v1323_v63, %v2656_v31 }
 0x7a8   : > { %v1803_v2 = vpop.f32.mrf.mxu0 }
 0x7a9   : > { %v1329_v3 = vsel %vm808_vm2, %v1324_v1, -inf }
 0x7aa   : > { %1330 = vmax.xlane.f32.xlu0 %v1329_v3  ;;  %v1326_v4 = vpop.f32.mrf.mxu0 }
 0x7ac   : > { %v1804_v5 = vpop.f32.mrf.mxu0 }
 0x833   : > { %v1331_v6 = vpop.xlane.xlu0 %1330 }
 0x834   : > { %v1332_v7 = vsub.f32 %v1324_v1, %v1331_v6 }
 0x836   : > { %v1333_v8 = vmul.f32 1.442695, %v1332_v7 }
 0x838   : > { %1944 = vpow2.f32 %v1333_v8 }
 0x845   : > { %v1945_v9 = vpop.eup %1944 }
 0x846   : > { %v1335_v10 = vsel %vm808_vm2, %v1945_v9, 0.0 }
 0x847   : > { %1336 = vadd.xlane.f32.xlu1 %v1335_v10 }
 0x858   : > { %1341 = vrot.lane.b32.xlu1 %v2663_v55, %s2264_s28  ;;  %s2168_s28 = sshll.u32 %s2265_s12, 4  ;;  %s2169_s28 = int_to_ptr.vmem [resolvable:$false] %s2168_s28 }
 0x859   : > { %s2170_s29 = scalar_lea.vmem %s2169_s28, 256  ;;  %p2171_p7 = scmp.lt.s32.totalorder %s2753_s13, %s2169_s28 }
 0x85a   : > { %p2172_p2 = scmp.lt.s32.totalorder %s2170_s29, %s2164_s11 }
 0x85c   : > { %p2173_p0 = por %p2172_p2, %p2171_p7 }
 0x85e   : > { %p2174_p13 = pnand %p2173_p0, %p2167_p11 }
 0x861   : > { %v1272_v31 = vpop.f32.mrf.mxu1 }
 0x862   : > { %v1278_v11 = vadd.f32 %v1272_v31, %v1116_v0 }
 0x863   : > { %v1797_v12 = vpop.f32.mrf.mxu1 }
 0x865   : > { %v1275_v16 = vpop.f32.mrf.mxu1 }
 0x867   : > { %v1798_v17 = vpop.f32.mrf.mxu1 }
 0x8d0   : > { %v1337_v18 = vpop.xlane.xlu1 %1336 }
 0x8d1   : > { %1946 = vrcp.f32 %v1337_v18 }
 0x8d4   : > { %v1342_v19 = vpop.permute.xlu1 %1341 }
 0x8d5   : > { %v1347_v55 = vsel %vm870_vm4, %v1342_v19, 0 }
 0x8d6   : > { %1806 = vmatpush3.bf16.msra.mxu1 %v1347_v55 }
 0x8de   : > { %v1947_v21 = vpop.eup %1946 }
 0x8df   : > { %v1339_v22 = vmul.f32 %v1947_v21, %v1945_v9 }
 0x8e1   : > { %v1340_v23 = vpack.c.bf16 %v1339_v22, %v1339_v22 }
 0x8e3   : > { %1808 = vmatmul.mubr.msk.bf16.vlgmr.msra.gmra.mxu1 %vm808_vm2, %v1340_v23 }
 0x9a3   : > { %v1383_v24 = vpop.f32.mrf.mxu1 }
 0x9a4   : > { %v1389_v25 = vpack.c.bf16 %v1383_v24, %v1383_v24 }
 0x9a5   : > { %v1809_v26 = vpop.f32.mrf.mxu1 }
 0x9a6   : > { %1814 = vmatmul.mubr.msk.bf16.vlgmr.msra.gmra.mxu0 %vm808_vm2, %v1389_v25 }
 0x9a7   : > { %v1386_v27 = vpop.f32.mrf.mxu1 }
 0x9a9   : > { %v1810_v28 = vpop.f32.mrf.mxu1 }
 0xa66   : > { %v1430_v29 = vpop.f32.mrf.mxu0 }
 0xa67   : > { %v1436_v32 = vadd.f32 %v1430_v29, %v1278_v11 }
 0xa68   : > { %v1815_v33 = vpop.f32.mrf.mxu0 }
 0xa69   : > { %v1444_v34 = vadd.f32 %v1683_v30, %v1436_v32 }
 0xa6a   : > { %v1433_v35 = vpop.f32.mrf.mxu0 }
 0xa6b   : > { %1445 = vst.msk [vmem:[%s592_s6] sm:$0xff] %vm618_vm1, %v1444_v34 }
 0xa6c   : > { %v1816_v36 = vpop.f32.mrf.mxu0 }
 0xa6d   : > { %2177 = shalt.err (!%p2174_p13)
}
 0xa6e   : > { %s2178_s26 = scalar_lea.hbm %s2751_s10, 128  ;;  %s2182_s30 = scalar_lea.hbm %s2866_s15, 256 }
 0xa6f   : > { %p2179_p9 = scmp.ne.s32.totalorder %s2751_s10, %s2178_s26  ;;  %p2183_p10 = scmp.lt.s32.totalorder %s2751_s10, %s2866_s15 }
 0xa70   : > { %p2184_p5 = scmp.lt.s32.totalorder %s2182_s30, %s2178_s26 }
 0xa71   : > { %p2180_p1 = pnand %p2179_p9, %p2867_p6 }
 0xa72   : > { %p2185_p3 = por %p2184_p5, %p2183_p10 }
 0xa73   : > { %p2181_p12 = pneg %p2180_p1 }
 0xa75   : > { %p2186_p4 = pnand %p2185_p3, %p2181_p12 }
 0xa77   : > { %2189 = shalt.err (!%p2186_p4)
}
 0xa78   : > { %1841 = dma.vmem_to_hbm [thread:$0]  (%p2867_p6), %s2753_s13, 128, %s2751_s10, %s1447_s25  }
 0xa79 PF: > { %s2868_s14 = sld [smem:[#allocation24_spill]]  ;;  %p2871_p11 = scmp.ge.s32.totalorder %s2248_s24, 2 }
 0xa7a   : > { %s2869_s27 = sld [smem:[#allocation26_spill]] }
 0xa7f   : > { %s1472_s17 = sand.u32 1, %s2868_s14  }
 0xa80   : > { %p2870_p8 = scmp.ne.s32.totalorder %s2869_s27, 0  ;;  %s1473_s6 = scalar_lea.sflag [#allocation4], %s1472_s17 }
 0xa82   : > { %p1870_p7 = pnand %p2871_p11, %p2870_p8 }
 0xa84   : > { %p1871_p2 = pneg %p1870_p7 }
 0xa86   : > { %2231 = dma.done.wait (%p1871_p2), %s1473_s6, 128  }
 0xa87   : > { %2233 = vsyncadd (%p1871_p2), %s1473_s6, 4294967168  ;;  %s2872_s24 = sld [smem:[#allocation27_spill]]  ;;  %s2875_s21 = smov %s2240_s22 }
 0xa88   : > { %s2873_s23 = sld [smem:[#allocation25_spill]] }
 0xa89   : > { %s2874_s4 = sld [smem:[#allocation29_spill]] }
 0xa8d   : > { %p33_p0 = scmp.ge.s32.totalorder %s2872_s24, 4  }
 0xa8e   : > { %s2876_s22 = smov %s2873_s23 }
 0xa8f   : > { %s2877_s23 = smov %s2874_s4  ;;  %35 = sbr.rel (!%p33_p0) target bundleno = 18 (0x12), region = 166 }
 0xa94   :  { %1478 = vsyncpa [#allocation3], 1 }
 0xa95   :  { %1480 = vsyncpa [#allocation3 + $0x1], 1 }
 0xa96   :  { %1481 = vsyncpa [#allocation6], 1 }
 0xa97   :  { %1483 = vsyncpa [#allocation6 + $0x1], 1 }
 0xa98   :  { %1484 = vsyncpa [#allocation9], 1 }
 0xa99   :  { %1486 = vsyncpa [#allocation9 + $0x1], 1 }
 0xa9a   :  { %1487 = vsyncpa [#allocation12], 1 }
 0xa9b   :  { %1488 = vsyncpa [#allocation15], 1 }
 0xa9c   :  { %1489 = vsyncpa [#allocation4], 1 }
 0xa9d   :  { %1491 = vsyncpa [#allocation4 + $0x1], 1 }

</bundles_post_ra>
